<compile_context>
chip_gen: v7x
topology: tpu7x:2x2x1
jax: 0.10.0
libtpu: 0.0.40
codegen_flags: <defaults>
</compile_context>

<pallas_src>
import jax
import jax.numpy as jnp
from jax.experimental import pallas as pl
from jax.experimental.pallas import tpu as pltpu

BN_EPS = 1e-5
LANE = 128


# ---------------------------------------------------------------------------
# In-kernel building block: Conv1d(k=3,pad=1) + folded BN + ReLU (+MaxPool2)
# ---------------------------------------------------------------------------
def _conv_bn_relu(x_f32, w_ref, shift_ref, pool):
    """x_f32:   (Bt, L, Cin)  f32 value (VMEM-resident)
    w_ref:      (3*Cin, Cout) bf16 im2col weight (tap-major rows, BN-scaled)
    shift_ref:  (1, Cout)     f32 folded BN/bias shift
    returns:    (Bt, L or L//2, Cout) f32
    """
    Bt, L, Cin = x_f32.shape
    Cout = w_ref.shape[1]

    # Cast once to bf16 so halo + im2col move half the bytes.
    x = x_f32.astype(jnp.bfloat16)

    # In-kernel halo: zero rows at both time boundaries of each sample.
    zrow = jnp.zeros((Bt, 1, Cin), jnp.bfloat16)
    xp = jnp.concatenate([zrow, x, zrow], axis=1)                       # (Bt, L+2, Cin)
    # im2col: output row l sees [x[l-1], x[l], x[l+1]] channel blocks.
    cols = jnp.concatenate(
        [xp[:, 0:L, :], xp[:, 1:L + 1, :], xp[:, 2:L + 2, :]], axis=2)  # (Bt, L, 3*Cin)
    cols2d = cols.reshape(Bt * L, 3 * Cin)

    # Single MXU matmul per layer, f32 accumulation. BN scale is pre-folded
    # into w_ref, so only the shift add + ReLU remain on the VPU.
    y = jnp.dot(cols2d, w_ref[...], preferred_element_type=jnp.float32)  # (Bt*L, Cout)
    y = jnp.maximum(y + shift_ref[...], 0.0)

    if pool:  # MaxPool1d(kernel_size=2, stride=2); L even, pairs stay in-sample.
        y = jnp.max(y.reshape(Bt * L // 2, 2, Cout), axis=1)
        L = L // 2
    return y.reshape(Bt, L, Cout)


# ---------------------------------------------------------------------------
# Fused kernel: conv stack + adaptive avg pool + fc1 + ReLU + fc2
# ---------------------------------------------------------------------------
def eegcnn_fused_kernel(x_ref,
                        w1_ref, h1_ref,
                        w2_ref, h2_ref,
                        w3_ref, h3_ref,
                        w4_ref, h4_ref,
                        wf1_ref, bf1_ref, wf2_ref, bf2_ref,
                        o_ref):
    x = x_ref[...]                                         # (Bt, L, Cin) f32
    x = _conv_bn_relu(x, w1_ref, h1_ref, pool=True)        # (Bt, L/2, 64)
    x = _conv_bn_relu(x, w2_ref, h2_ref, pool=True)        # (Bt, L/4, 128)
    x = _conv_bn_relu(x, w3_ref, h3_ref, pool=True)        # (Bt, L/8, 256)
    x = _conv_bn_relu(x, w4_ref, h4_ref, pool=False)       # (Bt, L/8, 512)

    # AdaptiveAvgPool1d(1) -> fc1 -> ReLU -> (dropout = identity) -> fc2
    pooled = jnp.mean(x, axis=1)                           # (Bt, 512) f32
    h = jnp.dot(pooled.astype(jnp.bfloat16), wf1_ref[...],
                preferred_element_type=jnp.float32) + bf1_ref[...]
    h = jnp.maximum(h, 0.0)
    # TODO(synk): dropout is identity in eval mode; no stochastic mask emitted.
    logits = jnp.dot(h.astype(jnp.bfloat16), wf2_ref[...],
                     preferred_element_type=jnp.float32) + bf2_ref[...]
    o_ref[...] = logits                                    # (Bt, 128) lane-dense


# ---------------------------------------------------------------------------
# Wrapper: one pallas_call for the whole forward pass
# ---------------------------------------------------------------------------
def eegcnn_forward(params, x_ncl):
    x = jnp.transpose(x_ncl, (0, 2, 1)).astype(jnp.float32)   # NCL -> (B, L, Cin)
    B, L, Cin = x.shape
    assert L % 8 == 0, "seq_length must be divisible by 8 (three stride-2 maxpools)"

    # Batch tiling: largest tile <= 8; pad batch to a multiple of the tile so
    # block shapes stay (8,128)-friendly. Grid axis is 'parallel' (megacore).
    bt = min(B, 8)
    Bp = ((B + bt - 1) // bt) * bt
    if Bp != B:
        x = jnp.pad(x, ((0, Bp - B), (0, 0), (0, 0)))
    grid = (Bp // bt,)

    (w1, h1), (w2, h2), (w3, h3), (w4, h4) = params["convs"]
    wf1, bf1 = params["fc1"]
    wf2, bf2 = params["fc2"]          # already lane-padded to 128 output columns
    num_classes = params["num_classes"]

    def full_spec(arr):
        nd = arr.ndim
        return pl.BlockSpec(arr.shape, lambda b, _nd=nd: (0,) * _nd)

    weight_arrays = [w1, h1, w2, h2, w3, h3, w4, h4, wf1, bf1, wf2, bf2]
    in_specs = [pl.BlockSpec((bt, L, Cin), lambda b: (b, 0, 0))]
    in_specs += [full_spec(a) for a in weight_arrays]

    out_padded = pl.pallas_call(
        eegcnn_fused_kernel,
        out_shape=jax.ShapeDtypeStruct((Bp, LANE), jnp.float32),
        grid_spec=pltpu.PrefetchScalarGridSpec(
            num_scalar_prefetch=0,
            grid=grid,
            in_specs=in_specs,
            out_specs=pl.BlockSpec((bt, LANE), lambda b: (b, 0)),
        ),
        compiler_params=pltpu.CompilerParams(
            dimension_semantics=("parallel",),
        ),
    )(x, *weight_arrays)
    return out_padded[:B, :num_classes]


# ---------------------------------------------------------------------------
# Deterministic parameter construction (matches module shapes / init style)
# ---------------------------------------------------------------------------
def _fold_bn(conv_bias, gamma, beta, mean, var):
    scale = gamma / jnp.sqrt(var + BN_EPS)
    shift = beta + (conv_bias - mean) * scale
    return scale, shift


def make_params(key, num_channels=12, num_classes=3):
    assert num_classes <= LANE
    conv_defs = [(num_channels, 64), (64, 128), (128, 256), (256, 512)]
    keys = jax.random.split(key, len(conv_defs) + 2)
    convs = []
    for i, (cin, cout) in enumerate(conv_defs):
        # kaiming_normal_(mode='fan_out', nonlinearity='relu'): std = sqrt(2/(cout*3))
        std = (2.0 / (cout * 3)) ** 0.5
        w = jax.random.normal(keys[i], (cout, cin, 3), jnp.float32) * std
        # torch (Cout, Cin, 3) -> tap-major im2col weight (3*Cin, Cout)
        w_im2col = jnp.transpose(w, (2, 1, 0)).reshape(3 * cin, cout)
        conv_bias = jnp.zeros((cout,), jnp.float32)
        gamma = jnp.ones((cout,), jnp.float32)
        beta = jnp.zeros((cout,), jnp.float32)
        mean = jnp.zeros((cout,), jnp.float32)
        var = jnp.ones((cout,), jnp.float32)
        scale, shift = _fold_bn(conv_bias, gamma, beta, mean, var)
        # Fold the BN scale into the conv weight (per output channel), bf16.
        w_folded = (w_im2col * scale[None, :]).astype(jnp.bfloat16)
        convs.append((w_folded, shift.reshape(1, cout)))

    # xavier_normal_ for linear layers
    std1 = (2.0 / (512 + 256)) ** 0.5
    w1 = jax.random.normal(keys[-2], (256, 512), jnp.float32) * std1   # torch layout
    std2 = (2.0 / (256 + num_classes)) ** 0.5
    w2 = jax.random.normal(keys[-1], (num_classes, 256), jnp.float32) * std2

    wf1 = w1.T.astype(jnp.bfloat16)                                    # (512, 256)
    bf1 = jnp.zeros((1, 256), jnp.float32)
    wf2_pad = jnp.zeros((256, LANE), jnp.float32).at[:, :num_classes].set(w2.T)
    bf2_pad = jnp.zeros((1, LANE), jnp.float32)                        # bias is zero-init
    return {
        "convs": convs,
        "fc1": (wf1, bf1),
        "fc2": (wf2_pad.astype(jnp.bfloat16), bf2_pad),
        "num_classes": num_classes,
    }


# ---------------------------------------------------------------------------
# Pure-jnp reference (same bf16-operand / f32-accumulate math) for validation
# ---------------------------------------------------------------------------
def eegcnn_reference(params, x_ncl):
    x = jnp.transpose(x_ncl, (0, 2, 1)).astype(jnp.float32)
    pools = (True, True, True, False)
    for (w, shift), pool in zip(params["convs"], pools):
        B, L, Cin = x.shape
        Cout = w.shape[1]
        xp = jnp.pad(x, ((0, 0), (1, 1), (0, 0)))
        cols = jnp.concatenate(
            [xp[:, 0:L, :], xp[:, 1:L + 1, :], xp[:, 2:L + 2, :]], axis=2)
        y = jnp.einsum("blk,kc->blc", cols.astype(jnp.bfloat16), w,
                       preferred_element_type=jnp.float32)
        y = jnp.maximum(y + shift[0], 0.0)
        if pool:
            y = jnp.max(y.reshape(B, L // 2, 2, Cout), axis=2)
        x = y
    pooled = jnp.mean(x, axis=1)
    wf1, bf1 = params["fc1"]
    wf2, bf2 = params["fc2"]
    h = jnp.maximum(jnp.dot(pooled.astype(jnp.bfloat16), wf1,
                            preferred_element_type=jnp.float32) + bf1, 0.0)
    logits = jnp.dot(h.astype(jnp.bfloat16), wf2,
                     preferred_element_type=jnp.float32) + bf2
    return logits[:, :params["num_classes"]]


# ---------------------------------------------------------------------------
if __name__ == "__main__":
    key = jax.random.PRNGKey(0)
    k_params, k_x = jax.random.split(key)

    batch, num_channels, seq_len, num_classes = 2, 12, 16, 3
    params = make_params(k_params, num_channels=num_channels, num_classes=num_classes)
    x = jax.random.normal(k_x, (batch, num_channels, seq_len), jnp.float32)

    logits = jax.block_until_ready(eegcnn_forward(params, x))
    ref = jax.block_until_ready(eegcnn_reference(params, x))

    assert logits.shape == (batch, num_classes)
    assert jnp.allclose(logits, ref, atol=2e-3, rtol=2e-3), "mismatch vs reference"

    print("KERNEL_OK")
</pallas_src>

<mosaic_0001>
module attributes {stable_mosaic.version = 11 : i64} {
  func.func @eegcnn_fused_kernel(%arg0: i32, %arg1: memref<2x16x12xf32, #tpu.memory_space<vmem>>, %arg2: memref<36x64xbf16, #tpu.memory_space<vmem>>, %arg3: memref<1x64xf32, #tpu.memory_space<vmem>>, %arg4: memref<192x128xbf16, #tpu.memory_space<vmem>>, %arg5: memref<1x128xf32, #tpu.memory_space<vmem>>, %arg6: memref<384x256xbf16, #tpu.memory_space<vmem>>, %arg7: memref<1x256xf32, #tpu.memory_space<vmem>>, %arg8: memref<768x512xbf16, #tpu.memory_space<vmem>>, %arg9: memref<1x512xf32, #tpu.memory_space<vmem>>, %arg10: memref<512x256xbf16, #tpu.memory_space<vmem>>, %arg11: memref<1x256xf32, #tpu.memory_space<vmem>>, %arg12: memref<256x128xbf16, #tpu.memory_space<vmem>>, %arg13: memref<1x128xf32, #tpu.memory_space<vmem>>, %arg14: memref<2x128xf32, #tpu.memory_space<vmem>>) attributes {dimension_semantics = [#tpu.dimension_semantics<parallel>], iteration_bounds = array<i64: 1>, scalar_prefetch = 0 : i64, scratch_operands = 0 : i64, tpu.core_type = #tpu.core_type<tc>, window_params = [{transform_indices = @transform_0, window_bounds = array<i64: 2, 16, 12>}, {pipeline_mode = #tpu.pipeline_mode<synchronous>, transform_indices = @transform_1, window_bounds = array<i64: 36, 64>}, {pipeline_mode = #tpu.pipeline_mode<synchronous>, transform_indices = @transform_2, window_bounds = array<i64: 1, 64>}, {pipeline_mode = #tpu.pipeline_mode<synchronous>, transform_indices = @transform_3, window_bounds = array<i64: 192, 128>}, {pipeline_mode = #tpu.pipeline_mode<synchronous>, transform_indices = @transform_4, window_bounds = array<i64: 1, 128>}, {pipeline_mode = #tpu.pipeline_mode<synchronous>, transform_indices = @transform_5, window_bounds = array<i64: 384, 256>}, {pipeline_mode = #tpu.pipeline_mode<synchronous>, transform_indices = @transform_6, window_bounds = array<i64: 1, 256>}, {pipeline_mode = #tpu.pipeline_mode<synchronous>, transform_indices = @transform_7, window_bounds = array<i64: 768, 512>}, {pipeline_mode = #tpu.pipeline_mode<synchronous>, transform_indices = @transform_8, window_bounds = array<i64: 1, 512>}, {pipeline_mode = #tpu.pipeline_mode<synchronous>, transform_indices = @transform_9, window_bounds = array<i64: 512, 256>}, {pipeline_mode = #tpu.pipeline_mode<synchronous>, transform_indices = @transform_10, window_bounds = array<i64: 1, 256>}, {pipeline_mode = #tpu.pipeline_mode<synchronous>, transform_indices = @transform_11, window_bounds = array<i64: 256, 128>}, {pipeline_mode = #tpu.pipeline_mode<synchronous>, transform_indices = @transform_12, window_bounds = array<i64: 1, 128>}, {transform_indices = @transform_13, window_bounds = array<i64: 2, 128>}]} {
    %c0 = arith.constant 0 : index
    %c0_0 = arith.constant 0 : index
    %c0_1 = arith.constant 0 : index
    %0 = vector.load %arg1[%c0, %c0_0, %c0_1] : memref<2x16x12xf32, #tpu.memory_space<vmem>>, vector<2x16x12xf32>
    %1 = arith.truncf %0 : vector<2x16x12xf32> to vector<2x16x12xbf16>
    %cst = arith.constant 0.000000e+00 : bf16
    %2 = vector.broadcast %cst : bf16 to vector<2x1x12xbf16>
    %3 = tpu.concatenate %2, %1, %2 in 1 : vector<2x1x12xbf16>, vector<2x16x12xbf16>, vector<2x1x12xbf16> -> vector<2x18x12xbf16>
    %4 = vector.extract_strided_slice %3 {offsets = [0, 0, 0], sizes = [2, 16, 12], strides = [1, 1, 1]} : vector<2x18x12xbf16> to vector<2x16x12xbf16>
    %5 = vector.extract_strided_slice %3 {offsets = [0, 1, 0], sizes = [2, 16, 12], strides = [1, 1, 1]} : vector<2x18x12xbf16> to vector<2x16x12xbf16>
    %6 = vector.extract_strided_slice %3 {offsets = [0, 2, 0], sizes = [2, 16, 12], strides = [1, 1, 1]} : vector<2x18x12xbf16> to vector<2x16x12xbf16>
    %7 = tpu.concatenate %4, %5, %6 in 2 : vector<2x16x12xbf16>, vector<2x16x12xbf16>, vector<2x16x12xbf16> -> vector<2x16x36xbf16>
    %8 = vector.shape_cast %7 : vector<2x16x36xbf16> to vector<32x36xbf16>
    %c0_2 = arith.constant 0 : index
    %c0_3 = arith.constant 0 : index
    %9 = vector.load %arg2[%c0_2, %c0_3] : memref<36x64xbf16, #tpu.memory_space<vmem>>, vector<36x64xbf16>
    %cst_4 = arith.constant dense<0.000000e+00> : vector<32x64xf32>
    %10 = tpu.matmul %8, %9, %cst_4 {dimension_numbers = #tpu.dot_dimension_numbers<[1], [0], [0], [1], [0, 0, 1, 1], [], []>} : vector<32x36xbf16>, vector<36x64xbf16>, vector<32x64xf32> -> vector<32x64xf32>
    %c0_5 = arith.constant 0 : index
    %c0_6 = arith.constant 0 : index
    %11 = vector.load %arg3[%c0_5, %c0_6] : memref<1x64xf32, #tpu.memory_space<vmem>>, vector<1x64xf32>
    %12 = vector.broadcast %11 : vector<1x64xf32> to vector<32x64xf32>
    %13 = arith.addf %10, %12 : vector<32x64xf32>
    %cst_7 = arith.constant 0.000000e+00 : f32
    %14 = vector.broadcast %cst_7 : f32 to vector<32x64xf32>
    %15 = arith.maximumf %13, %14 : vector<32x64xf32>
    %16 = vector.shape_cast %15 : vector<32x64xf32> to vector<16x2x64xf32>
    %cst_8 = arith.constant dense<0xFF800000> : vector<16x64xf32>
    %17 = vector.multi_reduction <maximumf>, %16, %cst_8 [1] : vector<16x2x64xf32> to vector<16x64xf32>
    %18 = vector.shape_cast %17 : vector<16x64xf32> to vector<2x8x64xf32>
    %19 = arith.truncf %18 : vector<2x8x64xf32> to vector<2x8x64xbf16>
    %cst_9 = arith.constant 0.000000e+00 : bf16
    %20 = vector.broadcast %cst_9 : bf16 to vector<2x1x64xbf16>
    %21 = tpu.concatenate %20, %19, %20 in 1 : vector<2x1x64xbf16>, vector<2x8x64xbf16>, vector<2x1x64xbf16> -> vector<2x10x64xbf16>
    %22 = vector.extract_strided_slice %21 {offsets = [0, 0, 0], sizes = [2, 8, 64], strides = [1, 1, 1]} : vector<2x10x64xbf16> to vector<2x8x64xbf16>
    %23 = vector.extract_strided_slice %21 {offsets = [0, 1, 0], sizes = [2, 8, 64], strides = [1, 1, 1]} : vector<2x10x64xbf16> to vector<2x8x64xbf16>
    %24 = vector.extract_strided_slice %21 {offsets = [0, 2, 0], sizes = [2, 8, 64], strides = [1, 1, 1]} : vector<2x10x64xbf16> to vector<2x8x64xbf16>
    %25 = tpu.concatenate %22, %23, %24 in 2 : vector<2x8x64xbf16>, vector<2x8x64xbf16>, vector<2x8x64xbf16> -> vector<2x8x192xbf16>
    %26 = vector.shape_cast %25 : vector<2x8x192xbf16> to vector<16x192xbf16>
    %c0_10 = arith.constant 0 : index
    %c0_11 = arith.constant 0 : index
    %27 = vector.load %arg4[%c0_10, %c0_11] : memref<192x128xbf16, #tpu.memory_space<vmem>>, vector<192x128xbf16>
    %cst_12 = arith.constant dense<0.000000e+00> : vector<16x128xf32>
    %28 = tpu.matmul %26, %27, %cst_12 {dimension_numbers = #tpu.dot_dimension_numbers<[1], [0], [0], [1], [0, 0, 1, 1], [], []>} : vector<16x192xbf16>, vector<192x128xbf16>, vector<16x128xf32> -> vector<16x128xf32>
    %c0_13 = arith.constant 0 : index
    %c0_14 = arith.constant 0 : index
    %29 = vector.load %arg5[%c0_13, %c0_14] : memref<1x128xf32, #tpu.memory_space<vmem>>, vector<1x128xf32>
    %30 = vector.broadcast %29 : vector<1x128xf32> to vector<16x128xf32>
    %31 = arith.addf %28, %30 : vector<16x128xf32>
    %cst_15 = arith.constant 0.000000e+00 : f32
    %32 = vector.broadcast %cst_15 : f32 to vector<16x128xf32>
    %33 = arith.maximumf %31, %32 : vector<16x128xf32>
    %34 = vector.shape_cast %33 : vector<16x128xf32> to vector<8x2x128xf32>
    %cst_16 = arith.constant dense<0xFF800000> : vector<8x128xf32>
    %35 = vector.multi_reduction <maximumf>, %34, %cst_16 [1] : vector<8x2x128xf32> to vector<8x128xf32>
    %36 = vector.shape_cast %35 : vector<8x128xf32> to vector<2x4x128xf32>
    %37 = arith.truncf %36 : vector<2x4x128xf32> to vector<2x4x128xbf16>
    %cst_17 = arith.constant 0.000000e+00 : bf16
    %38 = vector.broadcast %cst_17 : bf16 to vector<2x1x128xbf16>
    %39 = tpu.concatenate %38, %37, %38 in 1 : vector<2x1x128xbf16>, vector<2x4x128xbf16>, vector<2x1x128xbf16> -> vector<2x6x128xbf16>
    %40 = vector.extract_strided_slice %39 {offsets = [0, 0, 0], sizes = [2, 4, 128], strides = [1, 1, 1]} : vector<2x6x128xbf16> to vector<2x4x128xbf16>
    %41 = vector.extract_strided_slice %39 {offsets = [0, 1, 0], sizes = [2, 4, 128], strides = [1, 1, 1]} : vector<2x6x128xbf16> to vector<2x4x128xbf16>
    %42 = vector.extract_strided_slice %39 {offsets = [0, 2, 0], sizes = [2, 4, 128], strides = [1, 1, 1]} : vector<2x6x128xbf16> to vector<2x4x128xbf16>
    %43 = tpu.concatenate %40, %41, %42 in 2 : vector<2x4x128xbf16>, vector<2x4x128xbf16>, vector<2x4x128xbf16> -> vector<2x4x384xbf16>
    %44 = vector.shape_cast %43 : vector<2x4x384xbf16> to vector<8x384xbf16>
    %c0_18 = arith.constant 0 : index
    %c0_19 = arith.constant 0 : index
    %45 = vector.load %arg6[%c0_18, %c0_19] : memref<384x256xbf16, #tpu.memory_space<vmem>>, vector<384x256xbf16>
    %cst_20 = arith.constant dense<0.000000e+00> : vector<8x256xf32>
    %46 = tpu.matmul %44, %45, %cst_20 {dimension_numbers = #tpu.dot_dimension_numbers<[1], [0], [0], [1], [0, 0, 1, 1], [], []>} : vector<8x384xbf16>, vector<384x256xbf16>, vector<8x256xf32> -> vector<8x256xf32>
    %c0_21 = arith.constant 0 : index
    %c0_22 = arith.constant 0 : index
    %47 = vector.load %arg7[%c0_21, %c0_22] : memref<1x256xf32, #tpu.memory_space<vmem>>, vector<1x256xf32>
    %48 = vector.broadcast %47 : vector<1x256xf32> to vector<8x256xf32>
    %49 = arith.addf %46, %48 : vector<8x256xf32>
    %cst_23 = arith.constant 0.000000e+00 : f32
    %50 = vector.broadcast %cst_23 : f32 to vector<8x256xf32>
    %51 = arith.maximumf %49, %50 : vector<8x256xf32>
    %52 = vector.shape_cast %51 : vector<8x256xf32> to vector<4x2x256xf32>
    %cst_24 = arith.constant dense<0xFF800000> : vector<4x256xf32>
    %53 = vector.multi_reduction <maximumf>, %52, %cst_24 [1] : vector<4x2x256xf32> to vector<4x256xf32>
    %54 = vector.shape_cast %53 : vector<4x256xf32> to vector<2x2x256xf32>
    %55 = arith.truncf %54 : vector<2x2x256xf32> to vector<2x2x256xbf16>
    %cst_25 = arith.constant 0.000000e+00 : bf16
    %56 = vector.broadcast %cst_25 : bf16 to vector<2x1x256xbf16>
    %57 = tpu.concatenate %56, %55, %56 in 1 : vector<2x1x256xbf16>, vector<2x2x256xbf16>, vector<2x1x256xbf16> -> vector<2x4x256xbf16>
    %58 = vector.extract_strided_slice %57 {offsets = [0, 0, 0], sizes = [2, 2, 256], strides = [1, 1, 1]} : vector<2x4x256xbf16> to vector<2x2x256xbf16>
    %59 = vector.extract_strided_slice %57 {offsets = [0, 1, 0], sizes = [2, 2, 256], strides = [1, 1, 1]} : vector<2x4x256xbf16> to vector<2x2x256xbf16>
    %60 = vector.extract_strided_slice %57 {offsets = [0, 2, 0], sizes = [2, 2, 256], strides = [1, 1, 1]} : vector<2x4x256xbf16> to vector<2x2x256xbf16>
    %61 = tpu.concatenate %58, %59, %60 in 2 : vector<2x2x256xbf16>, vector<2x2x256xbf16>, vector<2x2x256xbf16> -> vector<2x2x768xbf16>
    %62 = vector.shape_cast %61 : vector<2x2x768xbf16> to vector<4x768xbf16>
    %c0_26 = arith.constant 0 : index
    %c0_27 = arith.constant 0 : index
    %63 = vector.load %arg8[%c0_26, %c0_27] : memref<768x512xbf16, #tpu.memory_space<vmem>>, vector<768x512xbf16>
    %cst_28 = arith.constant dense<0.000000e+00> : vector<4x512xf32>
    %64 = tpu.matmul %62, %63, %cst_28 {dimension_numbers = #tpu.dot_dimension_numbers<[1], [0], [0], [1], [0, 0, 1, 1], [], []>} : vector<4x768xbf16>, vector<768x512xbf16>, vector<4x512xf32> -> vector<4x512xf32>
    %c0_29 = arith.constant 0 : index
    %c0_30 = arith.constant 0 : index
    %65 = vector.load %arg9[%c0_29, %c0_30] : memref<1x512xf32, #tpu.memory_space<vmem>>, vector<1x512xf32>
    %66 = vector.broadcast %65 : vector<1x512xf32> to vector<4x512xf32>
    %67 = arith.addf %64, %66 : vector<4x512xf32>
    %cst_31 = arith.constant 0.000000e+00 : f32
    %68 = vector.broadcast %cst_31 : f32 to vector<4x512xf32>
    %69 = arith.maximumf %67, %68 : vector<4x512xf32>
    %70 = vector.shape_cast %69 : vector<4x512xf32> to vector<2x2x512xf32>
    %cst_32 = arith.constant dense<0.000000e+00> : vector<2x512xf32>
    %71 = vector.multi_reduction <add>, %70, %cst_32 [1] : vector<2x2x512xf32> to vector<2x512xf32>
    %cst_33 = arith.constant 2.000000e+00 : f32
    %72 = vector.broadcast %cst_33 : f32 to vector<2x512xf32>
    %73 = arith.divf %71, %72 : vector<2x512xf32>
    %74 = arith.truncf %73 : vector<2x512xf32> to vector<2x512xbf16>
    %c0_34 = arith.constant 0 : index
    %c0_35 = arith.constant 0 : index
    %75 = vector.load %arg10[%c0_34, %c0_35] : memref<512x256xbf16, #tpu.memory_space<vmem>>, vector<512x256xbf16>
    %cst_36 = arith.constant dense<0.000000e+00> : vector<2x256xf32>
    %76 = tpu.matmul %74, %75, %cst_36 {dimension_numbers = #tpu.dot_dimension_numbers<[1], [0], [0], [1], [0, 0, 1, 1], [], []>} : vector<2x512xbf16>, vector<512x256xbf16>, vector<2x256xf32> -> vector<2x256xf32>
    %c0_37 = arith.constant 0 : index
    %c0_38 = arith.constant 0 : index
    %77 = vector.load %arg11[%c0_37, %c0_38] : memref<1x256xf32, #tpu.memory_space<vmem>>, vector<1x256xf32>
    %78 = vector.broadcast %77 : vector<1x256xf32> to vector<2x256xf32>
    %79 = arith.addf %76, %78 : vector<2x256xf32>
    %cst_39 = arith.constant 0.000000e+00 : f32
    %80 = vector.broadcast %cst_39 : f32 to vector<2x256xf32>
    %81 = arith.maximumf %79, %80 : vector<2x256xf32>
    %82 = arith.truncf %81 : vector<2x256xf32> to vector<2x256xbf16>
    %c0_40 = arith.constant 0 : index
    %c0_41 = arith.constant 0 : index
    %83 = vector.load %arg12[%c0_40, %c0_41] : memref<256x128xbf16, #tpu.memory_space<vmem>>, vector<256x128xbf16>
    %cst_42 = arith.constant dense<0.000000e+00> : vector<2x128xf32>
    %84 = tpu.matmul %82, %83, %cst_42 {dimension_numbers = #tpu.dot_dimension_numbers<[1], [0], [0], [1], [0, 0, 1, 1], [], []>} : vector<2x256xbf16>, vector<256x128xbf16>, vector<2x128xf32> -> vector<2x128xf32>
    %c0_43 = arith.constant 0 : index
    %c0_44 = arith.constant 0 : index
    %85 = vector.load %arg13[%c0_43, %c0_44] : memref<1x128xf32, #tpu.memory_space<vmem>>, vector<1x128xf32>
    %86 = vector.broadcast %85 : vector<1x128xf32> to vector<2x128xf32>
    %87 = arith.addf %84, %86 : vector<2x128xf32>
    %c0_45 = arith.constant 0 : index
    %c0_46 = arith.constant 0 : index
    %88 = vector.load %arg14[%c0_45, %c0_46] : memref<2x128xf32, #tpu.memory_space<vmem>>, vector<2x128xf32>
    tpu.vector_store %arg14[%c0_45, %c0_46], %87 {strides = array<i32>} : memref<2x128xf32, #tpu.memory_space<vmem>>, vector<2x128xf32>,
    return
  }
  func.func @transform_0(%arg0: i32) -> (i32, i32, i32) {
    %c0_i32 = arith.constant 0 : i32
    %c0_i32_0 = arith.constant 0 : i32
    %c0_i32_1 = arith.constant 0 : i32
    return %arg0, %c0_i32, %c0_i32_0 : i32, i32, i32
  }
  func.func @transform_1(%arg0: i32) -> (i32, i32) {
    %c0_i32 = arith.constant 0 : i32
    %c0_i32_0 = arith.constant 0 : i32
    %c0_i32_1 = arith.constant 0 : i32
    return %c0_i32, %c0_i32_0 : i32, i32
  }
  func.func @transform_2(%arg0: i32) -> (i32, i32) {
    %c0_i32 = arith.constant 0 : i32
    %c0_i32_0 = arith.constant 0 : i32
    %c0_i32_1 = arith.constant 0 : i32
    return %c0_i32, %c0_i32_0 : i32, i32
  }
  func.func @transform_3(%arg0: i32) -> (i32, i32) {
    %c0_i32 = arith.constant 0 : i32
    %c0_i32_0 = arith.constant 0 : i32
    %c0_i32_1 = arith.constant 0 : i32
    return %c0_i32, %c0_i32_0 : i32, i32
  }
  func.func @transform_4(%arg0: i32) -> (i32, i32) {
    %c0_i32 = arith.constant 0 : i32
    %c0_i32_0 = arith.constant 0 : i32
    %c0_i32_1 = arith.constant 0 : i32
    return %c0_i32, %c0_i32_0 : i32, i32
  }
  func.func @transform_5(%arg0: i32) -> (i32, i32) {
    %c0_i32 = arith.constant 0 : i32
    %c0_i32_0 = arith.constant 0 : i32
    %c0_i32_1 = arith.constant 0 : i32
    return %c0_i32, %c0_i32_0 : i32, i32
  }
  func.func @transform_6(%arg0: i32) -> (i32, i32) {
    %c0_i32 = arith.constant 0 : i32
    %c0_i32_0 = arith.constant 0 : i32
    %c0_i32_1 = arith.constant 0 : i32
    return %c0_i32, %c0_i32_0 : i32, i32
  }
  func.func @transform_7(%arg0: i32) -> (i32, i32) {
    %c0_i32 = arith.constant 0 : i32
    %c0_i32_0 = arith.constant 0 : i32
    %c0_i32_1 = arith.constant 0 : i32
    return %c0_i32, %c0_i32_0 : i32, i32
  }
  func.func @transform_8(%arg0: i32) -> (i32, i32) {
    %c0_i32 = arith.constant 0 : i32
    %c0_i32_0 = arith.constant 0 : i32
    %c0_i32_1 = arith.constant 0 : i32
    return %c0_i32, %c0_i32_0 : i32, i32
  }
  func.func @transform_9(%arg0: i32) -> (i32, i32) {
    %c0_i32 = arith.constant 0 : i32
    %c0_i32_0 = arith.constant 0 : i32
    %c0_i32_1 = arith.constant 0 : i32
    return %c0_i32, %c0_i32_0 : i32, i32
  }
  func.func @transform_10(%arg0: i32) -> (i32, i32) {
    %c0_i32 = arith.constant 0 : i32
    %c0_i32_0 = arith.constant 0 : i32
    %c0_i32_1 = arith.constant 0 : i32
    return %c0_i32, %c0_i32_0 : i32, i32
  }
  func.func @transform_11(%arg0: i32) -> (i32, i32) {
    %c0_i32 = arith.constant 0 : i32
    %c0_i32_0 = arith.constant 0 : i32
    %c0_i32_1 = arith.constant 0 : i32
    return %c0_i32, %c0_i32_0 : i32, i32
  }
  func.func @transform_12(%arg0: i32) -> (i32, i32) {
    %c0_i32 = arith.constant 0 : i32
    %c0_i32_0 = arith.constant 0 : i32
    %c0_i32_1 = arith.constant 0 : i32
    return %c0_i32, %c0_i32_0 : i32, i32
  }
  func.func @transform_13(%arg0: i32) -> (i32, i32) {
    %c0_i32 = arith.constant 0 : i32
    %c0_i32_0 = arith.constant 0 : i32
    return %arg0, %c0_i32 : i32, i32
  }
}

</mosaic_0001>

<bundles_post_ra>
// kernel: tpu_custom_call.1
= control target key start
LH: loop header
LB: loop body
LE: loop exit
PB: predicated region body
PF: predicated region fallthrough
CT: control target
= control target key end

     0   :  { %18 = vsyncpa [#allocation3], 0  ;;  %s5442_s0 = inlined_call_operand.vmem [shape: f32[2,16,12], index: 0, kind: input, shape index: {}]   ;;  %s5443_s1 = inlined_call_operand.vmem [shape: bf16[36,64], index: 1, kind: input, shape index: {}]   ;;  %s5444_s2 = inlined_call_operand.vmem [shape: f32[1,64], index: 2, kind: input, shape index: {}]   ;;  %s5445_s3 = inlined_call_operand.hbm [shape: bf16[192,128], index: 3, kind: input, shape index: {}]   ;;  %s5446_s4 = inlined_call_operand.vmem [shape: f32[1,128], index: 4, kind: input, shape index: {}]   ;;  %s5447_s5 = inlined_call_operand.hbm [shape: bf16[384,256], index: 5, kind: input, shape index: {}]   ;;  %s5448_s6 = inlined_call_operand.vmem [shape: f32[1,256], index: 6, kind: input, shape index: {}]   ;;  %s5449_s7 = inlined_call_operand.hbm [shape: bf16[768,512], index: 7, kind: input, shape index: {}]   ;;  %s5450_s8 = inlined_call_operand.vmem [shape: f32[1,512], index: 8, kind: input, shape index: {}]   ;;  %s5451_s9 = inlined_call_operand.hbm [shape: bf16[512,256], index: 9, kind: input, shape index: {}]   ;;  %s5452_s10 = inlined_call_operand.vmem [shape: f32[1,256], index: 10, kind: input, shape index: {}]   ;;  %s5453_s11 = inlined_call_operand.hbm [shape: bf16[256,128], index: 11, kind: input, shape index: {}]   ;;  %s5454_s12 = inlined_call_operand.vmem [shape: f32[1,128], index: 12, kind: input, shape index: {}]   ;;  %s5455_s13 = inlined_call_operand.hbm [shape: f32[2,128], index: 13, kind: output, shape index: {}]  }
   0x1   :  { %19 = vsyncpa [#allocation6], 0 }
   0x2   :  { %20 = vsyncpa [#allocation9], 0 }
   0x3   :  { %21 = vsyncpa [#allocation4], 0  ;;  %s5007_s25 = smov [#allocation5]   ;;  %s4867_s29 = scalar_lea.hbm %s5447_s5, 6144 }
   0x4   :  { %s47_s26 = sshll.u32 %s5007_s25, 4  ;;  %p4868_p0 = scmp.ne.s32.totalorder %s5447_s5, %s4867_s29  ;;  %s48_s26 = int_to_ptr.vmem [resolvable:$true] %s47_s26 }
   0x5   :  { %p4871_p1 = scmp.lt.u32.totalorder %s4867_s29, %s5447_s5 }
   0x7   :  { %p4873_p2 = pnand %p4871_p1, %p4868_p0 }
   0x9   :  { %4876 = shalt.err (!%p4873_p2)
}
   0xa   :  { %s4877_s17 = scalar_lea.vmem %s48_s26, 6144  ;;  %p4882_p4 = scmp.lt.s32.totalorder %s48_s26, %s48_s26 }
   0xb   :  { %p4878_p3 = scmp.ne.s32.totalorder %s48_s26, %s4877_s17  ;;  %p4883_p5 = scmp.lt.s32.totalorder %s4877_s17, %s4877_s17 }
   0xd   :  { %p4884_p6 = por %p4883_p5, %p4882_p4 }
   0xf   :  { %p4885_p7 = pnand %p4884_p6, %p4878_p3 }
  0x11   :  { %4888 = shalt.err (!%p4885_p7)
}
  0x12   :  { %s5008_s18 = smov 128   ;;  %s5009_s19 = smov 8  }
  0x13   :  { %53 = dma.hbm_to_vmem [thread:$0]  %s5447_s5, 6144, %s48_s26, [#allocation6], %s5008_s18, %s5008_s18, %s5009_s19  }
  0x14   :  { %s5010_s22 = smov [#allocation8]   ;;  %s5011_s24 = smov [#allocation2]  }
  0x15   :  { %s75_s23 = sshll.u32 %s5010_s22, 4  ;;  %s33_s25 = sshll.u32 %s5011_s24, 4  ;;  %s76_s23 = int_to_ptr.vmem [resolvable:$true] %s75_s23  ;;  %s34_s25 = int_to_ptr.vmem [resolvable:$true] %s33_s25 }
  0x16   :  { %s4889_s29 = scalar_lea.hbm %s5451_s9, 8192 }
  0x17   :  { %p4890_p8 = scmp.ne.s32.totalorder %s5451_s9, %s4889_s29  ;;  %p4893_p9 = scmp.lt.u32.totalorder %s4889_s29, %s5451_s9 }
  0x19   :  { %p4895_p10 = pnand %p4893_p9, %p4890_p8 }
  0x1b   :  { %4898 = shalt.err (!%p4895_p10)
}
  0x1c   :  { %s4899_s5 = scalar_lea.vmem %s76_s23, 8192  ;;  %p4904_p12 = scmp.lt.s32.totalorder %s76_s23, %s76_s23 }
  0x1d   :  { %p4900_p11 = scmp.ne.s32.totalorder %s76_s23, %s4899_s5  ;;  %p4905_p13 = scmp.lt.s32.totalorder %s4899_s5, %s4899_s5 }
  0x1f   :  { %p4906_p0 = por %p4905_p13, %p4904_p12 }
  0x21   :  { %p4907_p1 = pnand %p4906_p0, %p4900_p11 }
  0x23   :  { %4910 = shalt.err (!%p4907_p1)
}
  0x24   :  { %81 = dma.hbm_to_vmem [thread:$0]  %s5451_s9, 8192, %s76_s23, [#allocation9], %s5008_s18, %s5008_s18, %s5009_s19  }
  0x25   :  { %s4911_s22 = scalar_lea.hbm %s5445_s3, 1536 }
  0x26   :  { %p4912_p2 = scmp.ne.s32.totalorder %s5445_s3, %s4911_s22  ;;  %p4915_p3 = scmp.lt.u32.totalorder %s4911_s22, %s5445_s3 }
  0x28   :  { %p4917_p4 = pnand %p4915_p3, %p4912_p2 }
  0x2a   :  { %4920 = shalt.err (!%p4917_p4)
}
  0x2b   :  { %s4921_s30 = scalar_lea.vmem %s34_s25, 1536  ;;  %p4926_p6 = scmp.lt.s32.totalorder %s34_s25, %s34_s25 }
  0x2c   :  { %p4922_p5 = scmp.ne.s32.totalorder %s34_s25, %s4921_s30  ;;  %p4927_p7 = scmp.lt.s32.totalorder %s4921_s30, %s4921_s30 }
  0x2e   :  { %p4928_p8 = por %p4927_p7, %p4926_p6 }
  0x30   :  { %p4929_p9 = pnand %p4928_p8, %p4922_p5 }
  0x32   :  { %4932 = shalt.err (!%p4929_p9)
}
  0x33   :  { %s5012_s9 = smov 64   ;;  %s5013_s18 = smov 4  }
  0x34   :  { %39 = dma.hbm_to_vmem [thread:$0]  %s5445_s3, 1536, %s34_s25, [#allocation3], %s5012_s9, %s5012_s9, %s5013_s18  }
  0x35   :  { %s5014_s14 = smov [#allocation7]   ;;  %s4933_s26 = scalar_lea.hbm %s5449_s7, 24576 }
  0x36   :  { %s61_s15 = sshll.u32 %s5014_s14, 4  ;;  %p4934_p10 = scmp.ne.s32.totalorder %s5449_s7, %s4933_s26  ;;  %s62_s15 = int_to_ptr.vmem [resolvable:$true] %s61_s15 }
  0x37   :  { %p4937_p11 = scmp.lt.u32.totalorder %s4933_s26, %s5449_s7 }
  0x39   :  { %p4939_p12 = pnand %p4937_p11, %p4934_p10 }
  0x3b   :  { %4942 = shalt.err (!%p4939_p12)
}
  0x3c   :  { %s4943_s24 = scalar_lea.vmem %s62_s15, 24576  ;;  %p4948_p0 = scmp.lt.s32.totalorder %s62_s15, %s62_s15 }
  0x3d   :  { %p4944_p13 = scmp.ne.s32.totalorder %s62_s15, %s4943_s24  ;;  %p4949_p1 = scmp.lt.s32.totalorder %s4943_s24, %s4943_s24 }
  0x3f   :  { %p4950_p2 = por %p4949_p1, %p4948_p0 }
  0x41   :  { %p4951_p3 = pnand %p4950_p2, %p4944_p13 }
  0x43   :  { %4954 = shalt.err (!%p4951_p3)
}
  0x44   :  { %s5015_s3 = smov 256   ;;  %s5016_s25 = smov 16  }
  0x45   :  { %67 = dma.hbm_to_vmem [thread:$0]  %s5449_s7, 24576, %s62_s15, [#allocation6], %s5015_s3, %s5015_s3, %s5016_s25  }
  0x46   :  { %s5017_s29 = smov [#allocation10]   ;;  %s4955_s14 = scalar_lea.hbm %s5453_s11, 2048 }
  0x47   :  { %s89_s30 = sshll.u32 %s5017_s29, 4  ;;  %p4956_p4 = scmp.ne.s32.totalorder %s5453_s11, %s4955_s14  ;;  %s90_s30 = int_to_ptr.vmem [resolvable:$true] %s89_s30 }
  0x48   :  { %p4959_p5 = scmp.lt.u32.totalorder %s4955_s14, %s5453_s11 }
  0x4a   :  { %p4961_p6 = pnand %p4959_p5, %p4956_p4 }
  0x4c   :  { %4964 = shalt.err (!%p4961_p6)
}
  0x4d   :  { %s4965_s20 = scalar_lea.vmem %s90_s30, 2048  ;;  %p4970_p8 = scmp.lt.s32.totalorder %s90_s30, %s90_s30 }
  0x4e   :  { %p4966_p7 = scmp.ne.s32.totalorder %s90_s30, %s4965_s20  ;;  %p4971_p9 = scmp.lt.s32.totalorder %s4965_s20, %s4965_s20 }
  0x50   :  { %p4972_p10 = por %p4971_p9, %p4970_p8 }
  0x52   :  { %p4973_p11 = pnand %p4972_p10, %p4966_p7 }
  0x54   :  { %4976 = shalt.err (!%p4973_p11)
}
  0x55   :  { %95 = dma.hbm_to_vmem [thread:$0]  %s5453_s11, 2048, %s90_s30, [#allocation9], %s5012_s9, %s5012_s9, %s5013_s18  }
  0x56   :  { %4999 = dma.done.wait [#allocation3], 1536  }
  0x57   :  { %5000 = vsyncadd [#allocation3], 4294965760 }
  0x58   :  { %5001 = dma.done.wait [#allocation6], 30720  }
  0x59   :  { %5002 = vsyncadd [#allocation6], 4294936576 }
  0x5a   :  { %5003 = dma.done.wait [#allocation9], 10240  }
  0x5b   :  { %5004 = vsyncadd [#allocation9], 4294957056  ;;  %v114_v0 = vld [vmem:[%s5442_s0] sm:$0xff]  ;;  %v115_v1 = vld [vmem:[%s5442_s0 + $0x8] sm:$0xff]  ;;  %vm139_vm0 = vsmask.f32 256 }
  0x5c   :  { %v116_v2 = vld [vmem:[%s5442_s0 + $0x10] sm:$0xff]  ;;  %v118_v3 = vpack.c.bf16 %v115_v1, %v114_v0  ;;  %vm138_vm1 = vcmask 1040384   ;;  %v117_v4 = vld [vmem:[%s5442_s0 + $0x18] sm:$0xff]  ;;  %v4380_v6 = vld [vmem:[%s5443_s1] sm:$0xff]   ;;  %vm231_vm2 = vcmask 1041408   ;;  %vm178_vm4 = vcmask 1046528  }
  0x5d   :  { %v119_v5 = vpack.c.bf16 %v117_v4, %v116_v2  ;;  %v4381_v9 = vld [vmem:[%s5443_s1 + $0x8] sm:$0xff]   ;;  %4320 = vmatprep.subr.bf16.mxu0 %v4380_v6  ;;  %v4382_v12 = vld [vmem:[%s5443_s1 + $0x10] ss:$0 sps:$4 sm:$0x33]   ;;  %vm145_vm3 = vsmask.f32 7424  ;;  %vm5183_vm5 = vmand %vm138_vm1, %vm139_vm0  ;;  %v296_v1 = vlaneseq }
  0x5e   :  { %v121_v7 = vshrl.u32 %v118_v3, 16  ;;  %v124_v8 = vshll.u32 %v118_v3, 16  ;;  %4321 = vmatpush3.bf16.msra.mxu0 %v4380_v6  ;;  %v233_v16 = vsel %vm231_vm2, %v4382_v12, 0  ;;  %s5018_s0 = smov 24   ;;  %s5019_s1 = smov 12   ;;  %vm189_vm6 = vcmask 97280  }
  0x5f   :  { %v128_v10 = vshrl.u32 %v119_v5, 16  ;;  %v131_v11 = vshll.u32 %v119_v5, 16  ;;  %4322 = vmatprep.subr.bf16.mxu0 %v4381_v9  ;;  %vm194_vm7 = vcmask 195584   ;;  %vm226_vm8 = vcmask 293888   ;;  %v4383_v51 = vld [vmem:[#allocation2] sm:$0xff]   ;;  %v4384_v53 = vld [vmem:[#allocation2 + $0x8] sm:$0xff]  }
  0x60   :  { %v123_v13 = vrot.slane %v121_v7, 7  ;;  %v5020_v52 = vmov 0   ;;  %v4385_v54 = vld [vmem:[#allocation2 + $0x10] sm:$0xff]   ;;  %v4386_v55 = vld [vmem:[#allocation2 + $0x18] sm:$0xff]   ;;  %v4387_v56 = vld [vmem:[#allocation2 + $0x20] sm:$0xff]   ;;  %v5213_v3 = vshrl.u32 %v296_v1, 7 }
  0x61   :  { %v130_v15 = vrot.slane %v128_v10, 7  ;;  %708 = vmatprep.subr.bf16.mxu1 %v5020_v52  ;;  %v4388_v57 = vld [vmem:[#allocation2 + $0x28] sm:$0xff]   ;;  %v4389_v58 = vld [vmem:[#allocation2 + $0x30] sm:$0xff]   ;;  %v4390_v59 = vld [vmem:[#allocation2 + $0x38] sm:$0xff]   ;;  %v5021_v63 = vmov 1983009808  }
  0x62   :  { %v126_v17 = vor.u32 %v124_v8, %v123_v13  ;;  %v143_v18 = vsel %vm5183_vm5, %v123_v13, 0  ;;  %4323 = vmatpush3.bf16.msra.mxu0 %v4381_v9  ;;  %709 = vmatpush1.bf16.msra.mxu1 %v4383_v51  ;;  %v4391_v60 = vld [vmem:[#allocation2 + $0x40] sm:$0xff]   ;;  %v4392_v61 = vld [vmem:[#allocation2 + $0x48] sm:$0xff]   ;;  %v4393_v62 = vld [vmem:[#allocation2 + $0x50] sm:$0xff]   ;;  %v294_v0 = vunpack.c.l.s4 %v5021_v63  ;;  %vm376_vm9 = vcmask 517120  }
  0x63   :  { %v154_v19 = vshll.u32 %v143_v18, 16  ;;  %v180_v20 = vrot.slane %v143_v18, 1  ;;  %v133_v21 = vor.u32 %v131_v11, %v130_v15  ;;  %v144_v22 = vsel %vm5183_vm5, %v130_v15, 0  ;;  %4362 = vmatprep.subr.msk.bf16.mxu0 %vm231_vm2, %v4382_v12  ;;  %710 = vmatprep.subr.bf16.mxu1 %v5020_v52  ;;  %v5218_v4 = vld [vmem:[%s5444_s2] ss:$0 sm:$0xff] }
  0x64   :  { %v141_v23 = vsel %vm5183_vm5, 0, %v126_v17  ;;  %v166_v24 = vshll.u32 %v144_v22, 16  ;;  %v183_v25 = vrot.slane %v144_v22, 1  ;;  %v295_v2 = vunpack.c.0.s8 %v294_v0 }
  0x65   :  { %v147_v26 = vshrl.u32 %v141_v23, 16  ;;  %v149_v27 = vshll.u32 %v141_v23, 16  ;;  %v156_v28 = vrot.slane %v154_v19, 1  ;;  %v179_v29 = vrot.slane %v141_v23, 1 }
  0x66   :  { %v142_v30 = vsel %vm5183_vm5, 0, %v133_v21  ;;  %v168_v31 = vrot.slane %v166_v24, 1  ;;  %4325 = vmatpush3.bf16.msra.mxu0 %v233_v16  ;;  %711 = vmatpush1.bf16.msra.mxu1 %v4384_v53  ;;  %v5222_v7 = vsub.s32 %v295_v2, %v5213_v3  ;;  %vm537_vm10 = vcmask 1042434  }
  0x67   :  { %v151_v32 = vrot.slane %v149_v27, 1  ;;  %v181_v33 = vsel %vm178_vm4, %v179_v29, %v180_v20  ;;  %v159_v34 = vshrl.u32 %v142_v30, 16  ;;  %v161_v35 = vshll.u32 %v142_v30, 16  ;;  %712 = vmatprep.subr.bf16.mxu1 %v5020_v52 }
  0x68   :  { %185 = vrot.lane.b32.xlu1 %v181_v33, %s5018_s0  ;;  %v182_v36 = vrot.slane %v142_v30, 1  ;;  %vm539_vm11 = vcmask 1043459   ;;  %vm541_vm12 = vcmask 1044484   ;;  %vm543_vm13 = vcmask 1045509  }
  0x69   :  { %v152_v37 = vor.u32 %v151_v32, %v147_v26  ;;  %v163_v38 = vrot.slane %v161_v35, 1  ;;  %vm545_vm14 = vcmask 1046534   ;;  %vm547_vm15 = vcmask 1047559  }
  0x6a   :  { %v184_v39 = vsel %vm178_vm4, %v182_v36, %v183_v25  ;;  %713 = vmatpush1.bf16.msra.mxu1 %v4385_v54  ;;  %vm561_vm0 = vcmask 1044480   ;;  %vm562_vm1 = vsmask.f32 4352  ;;  %vm588_vm4 = vcmask 523264  }
  0x6b   :  { %v157_v40 = vsel %vm145_vm3, %v152_v37, %v156_v28  ;;  %v164_v41 = vor.u32 %v163_v38, %v159_v34  ;;  %714 = vmatprep.subr.bf16.mxu1 %v5020_v52 }
  0x6c   :  { %170 = vrot.lane.b32.xlu0 %v157_v40, %s5019_s1  ;;  %187 = vrot.lane.b32.xlu1 %v184_v39, %s5018_s0 }
  0x6d   :  { %v169_v42 = vsel %vm145_vm3, %v164_v41, %v168_v31  ;;  %vm5274_vm3 = vmand %vm561_vm0, %vm562_vm1 }
  0x6e   :  { %715 = vmatpush1.bf16.msra.mxu1 %v4386_v55 }
  0x6f   :  { %716 = vmatprep.subr.bf16.mxu1 %v5020_v52 }
  0x70   :  { %172 = vrot.lane.b32.xlu0 %v169_v42, %s5019_s1 }
  0x72   :  { %717 = vmatpush1.bf16.msra.mxu1 %v4387_v56 }
  0x73   :  { %718 = vmatprep.subr.bf16.mxu1 %v5020_v52 }
  0x76   :  { %719 = vmatpush1.bf16.msra.mxu1 %v4388_v57 }
  0x77   :  { %720 = vmatprep.subr.bf16.mxu1 %v5020_v52 }
  0x7a   :  { %721 = vmatpush1.bf16.msra.mxu1 %v4389_v58 }
  0x7b   :  { %722 = vmatprep.subr.bf16.mxu1 %v5020_v52 }
  0x7e   :  { %723 = vmatpush1.bf16.msra.mxu1 %v4390_v59 }
  0x7f   :  { %724 = vmatprep.subr.bf16.mxu1 %v5020_v52 }
  0x82   :  { %725 = vmatpush1.bf16.msra.mxu1 %v4391_v60 }
  0x83   :  { %726 = vmatprep.subr.bf16.mxu1 %v5020_v52 }
  0x86   :  { %727 = vmatpush1.bf16.msra.mxu1 %v4392_v61 }
  0x87   :  { %728 = vmatprep.subr.bf16.mxu1 %v5020_v52 }
  0x8a   :  { %729 = vmatpush1.bf16.msra.mxu1 %v4393_v62 }
  0x8b   :  { %730 = vmatprep.subr.bf16.mxu1 %v5020_v52 }
  0xda   :  { %v186_v43 = vpop.permute.xlu1 %185 }
  0xde   :  { %v171_v44 = vpop.permute.xlu0 %170  ;;  %v188_v47 = vpop.permute.xlu1 %187 }
  0xdf   :  { %v191_v45 = vsel %vm189_vm6, %v141_v23, %v171_v44 }
  0xe0   :  { %v196_v46 = vsel %vm194_vm7, %v191_v45, %v186_v43 }
  0xe1   :  { %4326 = vmatprep.mubr.msk.bf16.mxu0 %vm226_vm8, %v196_v46 }
  0xe2   :  { %v173_v48 = vpop.permute.xlu0 %172 }
  0xe3   :  { %v193_v49 = vsel %vm189_vm6, %v142_v30, %v173_v48  ;;  %vm887_vm6 = vcmask 1042432  }
  0xe4   :  { %v198_v50 = vsel %vm194_vm7, %v193_v49, %v188_v47  ;;  %vm888_vm7 = vsmask.f32 2304 }
  0xe5   :  { %4327 = vmatmul.mubr.msk.bf16.vlgmr.msra.gmra.mrb[0].mxu0 %vm226_vm8, %v198_v50  ;;  %vm889_vm8 = vmand %vm887_vm6, %vm888_vm7 }
 0x1b8   :  { %v4328_v5 = vpop.f32.mrb[0].mxu0 }
 0x1b9   :  { %v278_v6 = vadd.f32 %v4328_v5, %v5218_v4  ;;  %v269_v8 = vpop.f32.mrb[1].mxu0 }
 0x1ba   :  { %v270_v9 = vadd.f32 %v5218_v4, %v269_v8  ;;  %v4329_v10 = vpop.f32.mrb[2].mxu0 }
 0x1bb   :  { %v286_v11 = vmax.f32 %v278_v6, 0.0  ;;  %v281_v12 = vadd.f32 %v4329_v10, %v5218_v4  ;;  %v5226_v13 = vpop.f32.mrb[3].mxu0 }
 0x1bc   :  { %v284_v15 = vmax.f32 %v270_v9, 0.0 }
 0x1bd   :  { %v326_v16 = vcombine.high %v286_v11, %v286_v11  ;;  %v333_v17 = vrot.slane %v286_v11, %v5222_v7  ;;  %v5232_v23 = vmax.f32 %v281_v12, 0.0 }
 0x1be   :  { %v292_v18 = vcombine.high %v284_v15, %v284_v15  ;;  %v299_v19 = vrot.slane %v284_v15, %v5222_v7 }
 0x1bf   :  { %v340_v20 = vrot.slane %v326_v16, %v5222_v7  ;;  %v341_v21 = vcombine.high %v333_v17, %v333_v17  ;;  %v433_v22 = vsel %vm376_vm9, %v333_v17, -inf }
 0x1c0   :  { %v434_v24 = vrot.slane %v433_v22, 4  ;;  %v306_v25 = vrot.slane %v292_v18, %v5222_v7  ;;  %v307_v26 = vcombine.high %v299_v19, %v299_v19  ;;  %v377_v27 = vsel %vm376_vm9, %v299_v19, -inf }
 0x1c1   :  { %v342_v28 = vcombine.high %v340_v20, %v340_v20  ;;  %v440_v29 = vsel %vm376_vm9, %v341_v21, -inf  ;;  %v447_v30 = vsel %vm376_vm9, %v340_v20, -inf  ;;  %v378_v31 = vrot.slane %v377_v27, 4 }
 0x1c2   :  { %v435_v32 = vmax.f32 %v433_v22, %v434_v24  ;;  %v441_v33 = vrot.slane %v440_v29, 4  ;;  %v448_v34 = vrot.slane %v447_v30, 4  ;;  %v308_v35 = vcombine.high %v306_v25, %v306_v25 }
 0x1c3   :  { %v454_v36 = vsel %vm376_vm9, %v342_v28, -inf  ;;  %v379_v37 = vmax.f32 %v377_v27, %v378_v31  ;;  %v384_v38 = vsel %vm376_vm9, %v307_v26, -inf  ;;  %v391_v39 = vsel %vm376_vm9, %v306_v25, -inf }
 0x1c4   :  { %v436_v40 = vrot.slane %v435_v32, 2  ;;  %v442_v41 = vmax.f32 %v440_v29, %v441_v33  ;;  %v449_v42 = vmax.f32 %v447_v30, %v448_v34  ;;  %v455_v43 = vrot.slane %v454_v36, 4 }
 0x1c5   :  { %v380_v44 = vrot.slane %v379_v37, 2  ;;  %v385_v45 = vrot.slane %v384_v38, 4  ;;  %v392_v46 = vrot.slane %v391_v39, 4  ;;  %v398_v47 = vsel %vm376_vm9, %v308_v35, -inf }
 0x1c6   :  { %v437_v48 = vmax.f32 %v435_v32, %v436_v40  ;;  %v443_v49 = vrot.slane %v442_v41, 2  ;;  %v450_v50 = vrot.slane %v449_v42, 2  ;;  %v456_v51 = vmax.f32 %v454_v36, %v455_v43 }
 0x1c7   :  { %v381_v53 = vmax.f32 %v379_v37, %v380_v44  ;;  %v386_v54 = vmax.f32 %v384_v38, %v385_v45  ;;  %v393_v55 = vmax.f32 %v391_v39, %v392_v46  ;;  %v399_v56 = vrot.slane %v398_v47, 4 }
 0x1c8   :  { %v438_v57 = vrot.slane %v437_v48, 1  ;;  %v444_v58 = vmax.f32 %v442_v41, %v443_v49  ;;  %v451_v59 = vmax.f32 %v449_v42, %v450_v50  ;;  %v457_v60 = vrot.slane %v456_v51, 2 }
 0x1c9   :  { %v382_v61 = vrot.slane %v381_v53, 1  ;;  %v387_v62 = vrot.slane %v386_v54, 2  ;;  %v394_v63 = vrot.slane %v393_v55, 2  ;;  %v400_v0 = vmax.f32 %v398_v47, %v399_v56 }
 0x1ca   :  { %v439_v1 = vmax.f32 %v437_v48, %v438_v57  ;;  %v445_v2 = vrot.slane %v444_v58, 1  ;;  %v452_v5 = vrot.slane %v451_v59, 1  ;;  %v458_v6 = vmax.f32 %v456_v51, %v457_v60 }
 0x1cb   :  { %v383_v8 = vmax.f32 %v381_v53, %v382_v61  ;;  %v388_v9 = vmax.f32 %v386_v54, %v387_v62  ;;  %v395_v10 = vmax.f32 %v393_v55, %v394_v63  ;;  %v401_v11 = vrot.slane %v400_v0, 2 }
 0x1cc   :  { %v446_v12 = vmax.f32 %v444_v58, %v445_v2  ;;  %v453_v15 = vmax.f32 %v451_v59, %v452_v5  ;;  %v459_v16 = vrot.slane %v458_v6, 1  ;;  %v497_v17 = vpack.c.bf16 %v439_v1, %v439_v1 }
 0x1cd   :  { %v389_v18 = vrot.slane %v388_v9, 1  ;;  %v396_v19 = vrot.slane %v395_v10, 1  ;;  %v402_v20 = vmax.f32 %v400_v0, %v401_v11  ;;  %v343_v21 = vcombine.high %v5232_v23, %v5232_v23 }
 0x1ce   :  { %v460_v22 = vmax.f32 %v458_v6, %v459_v16  ;;  %v498_v24 = vpack.c.bf16 %v446_v12, %v446_v12  ;;  %v499_v25 = vpack.c.bf16 %v453_v15, %v453_v15  ;;  %v273_v29 = vadd.f32 %v5218_v4, %v5226_v13 }
 0x1cf   :  { %v390_v26 = vmax.f32 %v388_v9, %v389_v18  ;;  %v397_v27 = vmax.f32 %v395_v10, %v396_v19  ;;  %v403_v28 = vrot.slane %v402_v20, 1  ;;  %v529_v30 = vunpack.c.l.b16 %v497_v17 }
 0x1d0   :  { %v530_v31 = vunpack.c.l.b16 %v498_v24  ;;  %v489_v32 = vpack.c.bf16 %v383_v8, %v383_v8  ;;  %v350_v33 = vrot.slane %v5232_v23, %v5222_v7  ;;  %v500_v34 = vpack.c.bf16 %v460_v22, %v460_v22 }
 0x1d1   :  { %v404_v35 = vmax.f32 %v402_v20, %v403_v28  ;;  %v490_v36 = vpack.c.bf16 %v390_v26, %v390_v26  ;;  %v357_v37 = vrot.slane %v343_v21, %v5222_v7  ;;  %v531_v38 = vunpack.c.l.b16 %v499_v25 }
 0x1d2   :  { %v491_v39 = vpack.c.bf16 %v397_v27, %v397_v27  ;;  %v358_v40 = vcombine.high %v350_v33, %v350_v33  ;;  %v461_v41 = vsel %vm376_vm9, %v350_v33, -inf  ;;  %v549_v42 = vsel %vm537_vm10, %v530_v31, %v529_v30 }
 0x1d3   :  { %v492_v43 = vpack.c.bf16 %v404_v35, %v404_v35  ;;  %v522_v4 = vunpack.c.l.b16 %v490_v36  ;;  %v285_v13 = vmax.f32 %v273_v29, 0.0  ;;  %v359_v44 = vcombine.high %v357_v37, %v357_v37 }
 0x1d4   :  { %v462_v45 = vrot.slane %v461_v41, 4  ;;  %v468_v46 = vsel %vm376_vm9, %v358_v40, -inf  ;;  %v475_v23 = vsel %vm376_vm9, %v357_v37, -inf  ;;  %v532_v47 = vunpack.c.l.b16 %v500_v34 }
 0x1d5   :  { %v521_v48 = vunpack.c.l.b16 %v489_v32  ;;  %v469_v49 = vrot.slane %v468_v46, 4  ;;  %v476_v50 = vrot.slane %v475_v23, 4  ;;  %v550_v51 = vsel %vm539_vm11, %v531_v38, %v549_v42 }
 0x1d6   :  { %v5254_v53 = vunpack.c.l.b16 %v491_v39  ;;  %v463_v54 = vmax.f32 %v461_v41, %v462_v45  ;;  %v482_v55 = vsel %vm376_vm9, %v359_v44, -inf  ;;  %v309_v59 = vcombine.high %v285_v13, %v285_v13 }
 0x1d7   :  { %v470_v56 = vmax.f32 %v468_v46, %v469_v49  ;;  %v477_v57 = vmax.f32 %v475_v23, %v476_v50  ;;  %v483_v58 = vrot.slane %v482_v55, 4  ;;  %v5257_v60 = vunpack.c.l.b16 %v492_v43 }
 0x1d8   :  { %v538_v61 = vsel %vm537_vm10, %v522_v4, %v521_v48  ;;  %v464_v62 = vrot.slane %v463_v54, 2  ;;  %v316_v63 = vrot.slane %v285_v13, %v5222_v7  ;;  %v323_v5 = vrot.slane %v309_v59, %v5222_v7 }
 0x1d9   :  { %v471_v0 = vrot.slane %v470_v56, 2  ;;  %v478_v1 = vrot.slane %v477_v57, 2  ;;  %v484_v2 = vmax.f32 %v482_v55, %v483_v58  ;;  %v551_v8 = vsel %vm541_vm12, %v532_v47, %v550_v51 }
 0x1da   :  { %v465_v6 = vmax.f32 %v463_v54, %v464_v62  ;;  %v324_v9 = vcombine.high %v316_v63, %v316_v63  ;;  %v405_v10 = vsel %vm376_vm9, %v316_v63, -inf  ;;  %v325_v16 = vcombine.high %v323_v5, %v323_v5 }
 0x1db   :  { %v472_v11 = vmax.f32 %v470_v56, %v471_v0  ;;  %v479_v12 = vmax.f32 %v477_v57, %v478_v1  ;;  %v485_v15 = vrot.slane %v484_v2, 2  ;;  %v406_v18 = vrot.slane %v405_v10, 4  ;;  %v4428_v1 = vld [vmem:[#allocation5 + $0xb0] ss:$8 sps:$4 sm:$0xff]  }
 0x1dc   :  { %v466_v17 = vrot.slane %v465_v6, 1  ;;  %v412_v19 = vsel %vm376_vm9, %v324_v9, -inf  ;;  %v419_v20 = vsel %vm376_vm9, %v323_v5, -inf  ;;  %v426_v29 = vsel %vm376_vm9, %v325_v16, -inf }
 0x1dd   :  { %v473_v21 = vrot.slane %v472_v11, 1  ;;  %v480_v22 = vrot.slane %v479_v12, 1  ;;  %v486_v24 = vmax.f32 %v484_v2, %v485_v15  ;;  %v413_v25 = vrot.slane %v412_v19, 4 }
 0x1de   :  { %v467_v26 = vmax.f32 %v465_v6, %v466_v17  ;;  %v407_v27 = vmax.f32 %v405_v10, %v406_v18  ;;  %v420_v28 = vrot.slane %v419_v20, 4  ;;  %v427_v37 = vrot.slane %v426_v29, 4 }
 0x1df   :  { %v474_v30 = vmax.f32 %v472_v11, %v473_v21  ;;  %v481_v31 = vmax.f32 %v479_v12, %v480_v22  ;;  %v487_v32 = vrot.slane %v486_v24, 1  ;;  %v414_v33 = vmax.f32 %v412_v19, %v413_v25 }
 0x1e0   :  { %v501_v34 = vpack.c.bf16 %v467_v26, %v467_v26  ;;  %v408_v35 = vrot.slane %v407_v27, 2  ;;  %v421_v36 = vmax.f32 %v419_v20, %v420_v28  ;;  %v428_v13 = vmax.f32 %v426_v29, %v427_v37  ;;  %v4395_v28 = vld [vmem:[#allocation5] ss:$8 sps:$4 sm:$0xff]   ;;  %v4397_v29 = vld [vmem:[#allocation5 + $0x4] ss:$8 sps:$4 sm:$0xff]  }
 0x1e1   :  { %v502_v38 = vpack.c.bf16 %v474_v30, %v474_v30  ;;  %v503_v39 = vpack.c.bf16 %v481_v31, %v481_v31  ;;  %v415_v40 = vrot.slane %v414_v33, 2  ;;  %v488_v41 = vmax.f32 %v486_v24, %v487_v32  ;;  %v4400_v30 = vld [vmem:[#allocation5 + $0x14] ss:$8 sps:$4 sm:$0xff]   ;;  %1262 = vmatprep.subr.bf16.mxu0 %v4397_v29  ;;  %v4403_v37 = vld [vmem:[#allocation5 + $0x24] ss:$8 sps:$4 sm:$0xff]  }
 0x1e2   :  { %v533_v42 = vunpack.c.l.b16 %v501_v34  ;;  %v409_v43 = vmax.f32 %v407_v27, %v408_v35  ;;  %v422_v4 = vrot.slane %v421_v36, 2  ;;  %v429_v50 = vrot.slane %v428_v13, 2  ;;  %1263 = vmatpush1.bf16.msra.mxu0 %v4395_v28  ;;  %v4398_v34 = vld [vmem:[#allocation5 + $0x10] ss:$8 sps:$4 sm:$0xff]  }
 0x1e3   :  { %v534_v44 = vunpack.c.l.b16 %v502_v38  ;;  %v535_v45 = vunpack.c.l.b16 %v503_v39  ;;  %v416_v46 = vmax.f32 %v414_v33, %v415_v40  ;;  %v504_v23 = vpack.c.bf16 %v488_v41, %v488_v41  ;;  %1264 = vmatprep.subr.bf16.mxu0 %v4400_v30  ;;  %v4401_v41 = vld [vmem:[#allocation5 + $0x20] ss:$8 sps:$4 sm:$0xff]  }
 0x1e4   :  { %v552_v47 = vsel %vm543_vm13, %v533_v42, %v551_v8  ;;  %v410_v48 = vrot.slane %v409_v43, 1  ;;  %v423_v49 = vmax.f32 %v421_v36, %v422_v4  ;;  %v540_v51 = vsel %vm539_vm11, %v5254_v53, %v538_v61  ;;  %v4404_v4 = vld [vmem:[#allocation5 + $0x30] ss:$8 sps:$4 sm:$0xff]  }
 0x1e5   :  { %v417_v54 = vrot.slane %v416_v46, 1  ;;  %v536_v55 = vunpack.c.l.b16 %v504_v23  ;;  %v553_v56 = vsel %vm545_vm14, %v534_v44, %v552_v47  ;;  %v430_v59 = vmax.f32 %v428_v13, %v429_v50  ;;  %v4409_v47 = vld [vmem:[#allocation5 + $0x44] ss:$8 sps:$4 sm:$0xff]   ;;  %v4410_v50 = vld [vmem:[#allocation5 + $0x50] ss:$8 sps:$4 sm:$0xff]  }
 0x1e6   :  { %v411_v57 = vmax.f32 %v409_v43, %v410_v48  ;;  %v424_v58 = vrot.slane %v423_v49, 1  ;;  %v554_v62 = vsel %vm547_vm15, %v535_v45, %v553_v56  ;;  %v542_v6 = vsel %vm541_vm12, %v5257_v60, %v540_v51  ;;  %v4394_v60 = vld [vmem:[#allocation2 + $0x58] sm:$0xff]   ;;  %1265 = vmatpush1.bf16.msra.mxu0 %v4398_v34  ;;  %v4407_v48 = vld [vmem:[#allocation5 + $0x40] ss:$8 sps:$4 sm:$0xff]   ;;  %v4415_v51 = vld [vmem:[#allocation5 + $0x64] ss:$8 sps:$4 sm:$0xff]  }
 0x1e7   :  { %v418_v63 = vmax.f32 %v416_v46, %v417_v54  ;;  %v556_v0 = vpack.c.b16 %v536_v55, %v554_v62  ;;  %v431_v5 = vrot.slane %v430_v59, 1  ;;  %731 = vmatpush1.bf16.msra.mxu1 %v4394_v60  ;;  %1266 = vmatprep.subr.bf16.mxu0 %v4403_v37  ;;  %v4406_v43 = vld [vmem:[#allocation5 + $0x34] ss:$8 sps:$4 sm:$0xff]   ;;  %v4413_v54 = vld [vmem:[#allocation5 + $0x60] ss:$8 sps:$4 sm:$0xff]  }
 0x1e8   :  { %v425_v2 = vmax.f32 %v423_v49, %v424_v58  ;;  %v493_v53 = vpack.c.bf16 %v411_v57, %v411_v57  ;;  %v4412_v49 = vld [vmem:[#allocation5 + $0x54] ss:$8 sps:$4 sm:$0xff]   ;;  %v4416_v56 = vld [vmem:[#allocation5 + $0x70] ss:$8 sps:$4 sm:$0xff]   ;;  %v4421_v57 = vld [vmem:[#allocation5 + $0x84] ss:$8 sps:$4 sm:$0xff]  }
 0x1e9   :  { %v494_v61 = vpack.c.bf16 %v418_v63, %v418_v63  ;;  %v560_v8 = vsel %vm5183_vm5, 0, %v556_v0  ;;  %v432_v11 = vmax.f32 %v430_v59, %v431_v5  ;;  %v4418_v55 = vld [vmem:[#allocation5 + $0x74] ss:$8 sps:$4 sm:$0xff]   ;;  %v4419_v58 = vld [vmem:[#allocation5 + $0x80] ss:$8 sps:$4 sm:$0xff]  }
 0x1ea   :  { %v495_v9 = vpack.c.bf16 %v425_v2, %v425_v2  ;;  %v525_v10 = vunpack.c.l.b16 %v493_v53  ;;  %v565_v12 = vsel %vm5274_vm3, %v560_v8, 0  ;;  %1267 = vmatpush1.bf16.msra.mxu0 %v4401_v41  ;;  %v4424_v59 = vld [vmem:[#allocation5 + $0x94] ss:$8 sps:$4 sm:$0xff]   ;;  %v4422_v62 = vld [vmem:[#allocation5 + $0x90] ss:$8 sps:$4 sm:$0xff]  }
 0x1eb   :  { %v526_v15 = vunpack.c.l.b16 %v494_v61  ;;  %v576_v16 = vshll.u32 %v565_v12, 16  ;;  %v496_v19 = vpack.c.bf16 %v432_v11, %v432_v11  ;;  %v574_v21 = vshrl.u32 %v565_v12, 16  ;;  %1268 = vmatprep.subr.bf16.mxu0 %v4406_v43  ;;  %v4427_v63 = vld [vmem:[#allocation5 + $0xa4] ss:$8 sps:$4 sm:$0xff]   ;;  %v4425_v0 = vld [vmem:[#allocation5 + $0xa0] ss:$8 sps:$4 sm:$0xff]  }
 0x1ec   :  { %v527_v17 = vunpack.c.l.b16 %v495_v9  ;;  %v544_v18 = vsel %vm543_vm13, %v525_v10, %v542_v6  ;;  %v587_v32 = vrot.slane %v565_v12, 1  ;;  %v4430_v2 = vld [vmem:[#allocation5 + $0xb4] ss:$8 sps:$4 sm:$0xff]   ;;  %v4433_v5 = vld [vmem:[#allocation5 + $0xc4] ss:$8 sps:$4 sm:$0xff]  }
 0x1ed   :  { %v546_v20 = vsel %vm545_vm14, %v526_v15, %v544_v18  ;;  %v578_v22 = vrot.slane %v576_v16, 1  ;;  %v528_v24 = vunpack.c.l.b16 %v496_v19  ;;  %v4431_v53 = vld [vmem:[#allocation5 + $0xc0] ss:$8 sps:$4 sm:$0xff]   ;;  %v4436_v61 = vld [vmem:[#allocation5 + $0xd4] ss:$8 sps:$4 sm:$0xff]  }
 0x1ee   :  { %v548_v25 = vsel %vm547_vm15, %v527_v17, %v546_v20  ;;  %1269 = vmatpush1.bf16.msra.mxu0 %v4404_v4  ;;  %v4434_v6 = vld [vmem:[#allocation5 + $0xd0] ss:$8 sps:$4 sm:$0xff]   ;;  %v4439_v8 = vld [vmem:[#allocation5 + $0xe4] ss:$8 sps:$4 sm:$0xff]   ;;  %v4437_v9 = vld [vmem:[#allocation5 + $0xe0] ss:$8 sps:$4 sm:$0xff]  }
 0x1ef   :  { %v579_v26 = vor.u32 %v578_v22, %v574_v21  ;;  %v555_v27 = vpack.c.b16 %v528_v24, %v548_v25  ;;  %1270 = vmatprep.subr.bf16.mxu0 %v4409_v47  ;;  %v4442_v10 = vld [vmem:[#allocation5 + $0xf4] ss:$8 sps:$4 sm:$0xff]   ;;  %v4440_v11 = vld [vmem:[#allocation5 + $0xf0] ss:$8 sps:$4 sm:$0xff]   ;;  %v3950_v17 = vld [vmem:[%s5446_s4] ss:$0 sm:$0xff] }
 0x1f0   :  { %v4467_v15 = vld [vmem:[#allocation7] ss:$16 sps:$4 sm:$0xff]   ;;  %v4469_v16 = vld [vmem:[#allocation7 + $0x4] ss:$16 sps:$4 sm:$0xff]   ;;  %vm1503_vm9 = vsmask.f32 1280 }
 0x1f1   :  { %582 = vrot.lane.b32.xlu1 %v579_v26, %s5012_s9  ;;  %v559_v31 = vsel %vm5183_vm5, 0, %v555_v27  ;;  %2853 = vmatprep.subr.bf16.mxu1 %v4469_v16 }
 0x1f2   :  { %v564_v33 = vsel %vm5274_vm3, %v559_v31, 0  ;;  %1271 = vmatpush1.bf16.msra.mxu0 %v4407_v48 }
 0x1f3   :  { %v586_v35 = vrot.slane %v564_v33, 1  ;;  %v569_v36 = vshll.u32 %v564_v33, 16  ;;  %v567_v39 = vshrl.u32 %v564_v33, 16  ;;  %1272 = vmatprep.subr.bf16.mxu0 %v4412_v49 }
 0x1f5   :  { %v3952_v38 = vcombine.low %v586_v35, %v587_v32  ;;  %v571_v40 = vrot.slane %v569_v36, 1 }
 0x1f6   :  { %1273 = vmatpush1.bf16.msra.mxu0 %v4410_v50 }
 0x1f7   :  { %3965 = vmatprep.mubr.msk.bf16.mxu1 %vm588_vm4, %v3952_v38  ;;  %v572_v42 = vor.u32 %v571_v40, %v567_v39  ;;  %1274 = vmatprep.subr.bf16.mxu0 %v4415_v51 }
 0x1f9   :  { %580 = vrot.lane.b32.xlu0 %v572_v42, %s5012_s9 }
 0x1fa   :  { %1275 = vmatpush1.bf16.msra.mxu0 %v4413_v54 }
 0x1fb   :  { %1276 = vmatprep.subr.bf16.mxu0 %v4418_v55 }
 0x1fe   :  { %1277 = vmatpush1.bf16.msra.mxu0 %v4416_v56 }
 0x1ff   :  { %1278 = vmatprep.subr.bf16.mxu0 %v4421_v57 }
 0x202   :  { %1279 = vmatpush1.bf16.msra.mxu0 %v4419_v58 }
 0x203   :  { %1280 = vmatprep.subr.bf16.mxu0 %v4424_v59 }
 0x206   :  { %1281 = vmatpush1.bf16.msra.mxu0 %v4422_v62 }
 0x207   :  { %1282 = vmatprep.subr.bf16.mxu0 %v4427_v63 }
 0x20a   :  { %1283 = vmatpush1.bf16.msra.mxu0 %v4425_v0 }
 0x20b   :  { %1284 = vmatprep.subr.bf16.mxu0 %v4430_v2 }
 0x20e   :  { %1285 = vmatpush1.bf16.msra.mxu0 %v4428_v1 }
 0x20f   :  { %1286 = vmatprep.subr.bf16.mxu0 %v4433_v5 }
 0x212   :  { %1287 = vmatpush1.bf16.msra.mxu0 %v4431_v53 }
 0x213   :  { %1288 = vmatprep.subr.bf16.mxu0 %v4436_v61 }
 0x216   :  { %1289 = vmatpush1.bf16.msra.mxu0 %v4434_v6 }
 0x217   :  { %1290 = vmatprep.subr.bf16.mxu0 %v4439_v8 }
 0x21a   :  { %1291 = vmatpush1.bf16.msra.mxu0 %v4437_v9 }
 0x21b   :  { %1292 = vmatprep.subr.bf16.mxu0 %v4442_v10 }
 0x21e   :  { %1293 = vmatpush1.bf16.msra.mxu0 %v4440_v11 }
 0x263   :  { %v583_v13 = vpop.permute.xlu1 %582 }
 0x264   :  { %v592_v44 = vsel %vm588_vm4, %v565_v12, %v583_v13  ;;  %v4445_v12 = vld [vmem:[#allocation5 + $0x104] ss:$8 sps:$4 sm:$0xff]  }
 0x265   :  { %1303 = vmatprep.subr.bf16.mxu0 %v4445_v12 }
 0x26b   :  { %v581_v45 = vpop.permute.xlu0 %580 }
 0x26c   :  { %v590_v46 = vsel %vm588_vm4, %v564_v33, %v581_v45 }
 0x26d   :  { %v3951_v23 = vcombine.low %v590_v46, %v592_v44 }
 0x26f   :  { %741 = vmatmul.mubr.bf16.vlgmr.msra.gmra.mrb[0].mxu1 %v3951_v23 }
 0x270   :  { %2854 = vmatpush1.bf16.msra.mxu1 %v4467_v15 }
 0x342   :  { %v742_v18 = vpop.f32.mrb[0].mxu1 }
 0x343   :  { %v743_v19 = vadd.f32 %v3950_v17, %v742_v18  ;;  %v744_v20 = vpop.f32.mrb[1].mxu1 }
 0x344   :  { %v745_v21 = vpop.f32.mrb[2].mxu1 }
 0x345   :  { %v749_v22 = vmax.f32 %v743_v19, 0.0  ;;  %v746_v60 = vadd.f32 %v3950_v17, %v745_v21  ;;  %v747_v24 = vpop.f32.mrb[3].mxu1 }
 0x347   :  { %v753_v25 = vcombine.high %v749_v22, %v749_v22  ;;  %v760_v26 = vrot.slane %v749_v22, %v5222_v7  ;;  %v750_v27 = vmax.f32 %v746_v60, 0.0 }
 0x349   :  { %v767_v28 = vrot.slane %v753_v25, %v5222_v7  ;;  %v768_v29 = vcombine.high %v760_v26, %v760_v26  ;;  %v795_v30 = vsel %vm231_vm2, %v760_v26, -inf  ;;  %v770_v31 = vcombine.high %v750_v27, %v750_v27 }
 0x34a   :  { %v796_v32 = vrot.slane %v795_v30, 4  ;;  %v777_v33 = vrot.slane %v750_v27, %v5222_v7 }
 0x34b   :  { %v769_v34 = vcombine.high %v767_v28, %v767_v28  ;;  %v802_v35 = vsel %vm231_vm2, %v768_v29, -inf  ;;  %v809_v36 = vsel %vm231_vm2, %v767_v28, -inf  ;;  %v784_v37 = vrot.slane %v770_v31, %v5222_v7 }
 0x34c   :  { %v797_v38 = vmax.f32 %v795_v30, %v796_v32  ;;  %v803_v39 = vrot.slane %v802_v35, 4  ;;  %v810_v40 = vrot.slane %v809_v36, 4  ;;  %v785_v41 = vcombine.high %v777_v33, %v777_v33 }
 0x34d   :  { %v816_v42 = vsel %vm231_vm2, %v769_v34, -inf  ;;  %v786_v43 = vcombine.high %v784_v37, %v784_v37  ;;  %v823_v4 = vsel %vm231_vm2, %v777_v33, -inf  ;;  %v837_v13 = vsel %vm231_vm2, %v784_v37, -inf }
 0x34e   :  { %v798_v44 = vrot.slane %v797_v38, 2  ;;  %v804_v45 = vmax.f32 %v802_v35, %v803_v39  ;;  %v811_v46 = vmax.f32 %v809_v36, %v810_v40  ;;  %v817_v23 = vrot.slane %v816_v42, 4 }
 0x34f   :  { %v824_v47 = vrot.slane %v823_v4, 4  ;;  %v830_v48 = vsel %vm231_vm2, %v785_v41, -inf  ;;  %v838_v49 = vrot.slane %v837_v13, 4  ;;  %v844_v50 = vsel %vm231_vm2, %v786_v43, -inf }
 0x350   :  { %v799_v51 = vmax.f32 %v797_v38, %v798_v44  ;;  %v805_v54 = vrot.slane %v804_v45, 2  ;;  %v812_v55 = vrot.slane %v811_v46, 2  ;;  %v818_v56 = vmax.f32 %v816_v42, %v817_v23 }
 0x351   :  { %v825_v57 = vmax.f32 %v823_v4, %v824_v47  ;;  %v831_v58 = vrot.slane %v830_v48, 4  ;;  %v839_v59 = vmax.f32 %v837_v13, %v838_v49  ;;  %v845_v62 = vrot.slane %v844_v50, 4 }
 0x352   :  { %v800_v63 = vrot.slane %v799_v51, 1  ;;  %v806_v0 = vmax.f32 %v804_v45, %v805_v54  ;;  %v813_v1 = vmax.f32 %v811_v46, %v812_v55  ;;  %v819_v2 = vrot.slane %v818_v56, 2 }
 0x353   :  { %v826_v5 = vrot.slane %v825_v57, 2  ;;  %v832_v53 = vmax.f32 %v830_v48, %v831_v58  ;;  %v840_v61 = vrot.slane %v839_v59, 2  ;;  %v846_v6 = vmax.f32 %v844_v50, %v845_v62 }
 0x354   :  { %v801_v8 = vmax.f32 %v799_v51, %v800_v63  ;;  %v807_v9 = vrot.slane %v806_v0, 1  ;;  %v814_v10 = vrot.slane %v813_v1, 1  ;;  %v820_v11 = vmax.f32 %v818_v56, %v819_v2 }
 0x355   :  { %v827_v12 = vmax.f32 %v825_v57, %v826_v5  ;;  %v833_v15 = vrot.slane %v832_v53, 2  ;;  %v841_v16 = vmax.f32 %v839_v59, %v840_v61  ;;  %v847_v17 = vrot.slane %v846_v6, 2 }
 0x356   :  { %v808_v18 = vmax.f32 %v806_v0, %v807_v9  ;;  %v815_v19 = vmax.f32 %v813_v1, %v814_v10  ;;  %v821_v20 = vrot.slane %v820_v11, 1  ;;  %v851_v21 = vpack.c.bf16 %v801_v8, %v801_v8 }
 0x357   :  { %v828_v22 = vrot.slane %v827_v12, 1  ;;  %v834_v60 = vmax.f32 %v832_v53, %v833_v15  ;;  %v842_v24 = vrot.slane %v841_v16, 1  ;;  %v848_v25 = vmax.f32 %v846_v6, %v847_v17 }
 0x358   :  { %v822_v26 = vmax.f32 %v820_v11, %v821_v20  ;;  %v852_v27 = vpack.c.bf16 %v808_v18, %v808_v18  ;;  %v853_v28 = vpack.c.bf16 %v815_v19, %v815_v19  ;;  %v867_v34 = vunpack.c.l.b16 %v851_v21  ;;  %v4443_v20 = vld [vmem:[#allocation5 + $0x100] ss:$8 sps:$4 sm:$0xff]   ;;  %v4448_v21 = vld [vmem:[#allocation5 + $0x114] ss:$8 sps:$4 sm:$0xff]  }
 0x359   :  { %v829_v29 = vmax.f32 %v827_v12, %v828_v22  ;;  %v835_v30 = vrot.slane %v834_v60, 1  ;;  %v843_v31 = vmax.f32 %v841_v16, %v842_v24  ;;  %v849_v32 = vrot.slane %v848_v25, 1  ;;  %v4446_v22 = vld [vmem:[#allocation5 + $0x110] ss:$8 sps:$4 sm:$0xff]   ;;  %v4449_v24 = vld [vmem:[#allocation5 + $0x120] ss:$8 sps:$4 sm:$0xff]  }
 0x35a   :  { %v854_v33 = vpack.c.bf16 %v822_v26, %v822_v26  ;;  %v868_v35 = vunpack.c.l.b16 %v852_v27  ;;  %v869_v36 = vunpack.c.l.b16 %v853_v28  ;;  %v4452_v26 = vld [vmem:[#allocation5 + $0x130] ss:$8 sps:$4 sm:$0xff]   ;;  %v4457_v27 = vld [vmem:[#allocation5 + $0x144] ss:$8 sps:$4 sm:$0xff]   ;;  %v4455_v28 = vld [vmem:[#allocation5 + $0x140] ss:$8 sps:$4 sm:$0xff]  }
 0x35b   :  { %v836_v37 = vmax.f32 %v834_v60, %v835_v30  ;;  %v850_v38 = vmax.f32 %v848_v25, %v849_v32  ;;  %v855_v39 = vpack.c.bf16 %v829_v29, %v829_v29  ;;  %v857_v40 = vpack.c.bf16 %v843_v31, %v843_v31  ;;  %v4451_v60 = vld [vmem:[#allocation5 + $0x124] ss:$8 sps:$4 sm:$0xff]   ;;  %v4454_v25 = vld [vmem:[#allocation5 + $0x134] ss:$8 sps:$4 sm:$0xff]   ;;  %v4458_v30 = vld [vmem:[#allocation5 + $0x150] ss:$8 sps:$4 sm:$0xff]  }
 0x35c   :  { %v870_v41 = vunpack.c.l.b16 %v854_v33  ;;  %v875_v42 = vsel %vm537_vm10, %v868_v35, %v867_v34  ;;  %v4460_v29 = vld [vmem:[#allocation5 + $0x154] ss:$8 sps:$4 sm:$0xff]   ;;  %v4463_v31 = vld [vmem:[#allocation5 + $0x164] ss:$8 sps:$4 sm:$0xff]   ;;  %v4464_v33 = vld [vmem:[#allocation5 + $0x170] ss:$8 sps:$4 sm:$0xff]  }
 0x35d   :  { %v876_v43 = vsel %vm539_vm11, %v869_v36, %v875_v42  ;;  %v856_v4 = vpack.c.bf16 %v836_v37, %v836_v37  ;;  %v858_v13 = vpack.c.bf16 %v850_v38, %v850_v38  ;;  %v873_v44 = vunpack.c.l.b16 %v857_v40  ;;  %v4466_v32 = vld [vmem:[#allocation5 + $0x174] ss:$8 sps:$4 sm:$0xff]   ;;  %v4470_v35 = vld [vmem:[#allocation7 + $0x8] ss:$16 sps:$4 sm:$0xff]  }
 0x35e   :  { %v877_v45 = vsel %vm541_vm12, %v870_v41, %v876_v43  ;;  %v871_v46 = vunpack.c.l.b16 %v855_v39  ;;  %v4472_v34 = vld [vmem:[#allocation7 + $0xc] ss:$16 sps:$4 sm:$0xff]   ;;  %v4475_v37 = vld [vmem:[#allocation7 + $0x24] ss:$16 sps:$4 sm:$0xff]   ;;  %v4473_v39 = vld [vmem:[#allocation7 + $0x20] ss:$16 sps:$4 sm:$0xff]  }
 0x35f   :  { %v872_v23 = vunpack.c.l.b16 %v856_v4  ;;  %v874_v47 = vunpack.c.l.b16 %v858_v13  ;;  %v881_v48 = vpack.c.b16 %v877_v45, %v877_v45  ;;  %v4478_v38 = vld [vmem:[#allocation7 + $0x2c] ss:$16 sps:$4 sm:$0xff]   ;;  %v4476_v40 = vld [vmem:[#allocation7 + $0x28] ss:$16 sps:$4 sm:$0xff]   ;;  %2855 = vmatprep.subr.bf16.mxu1 %v4475_v37  ;;  %v4481_v41 = vld [vmem:[#allocation7 + $0x44] ss:$16 sps:$4 sm:$0xff]  }
 0x360   :  { %2856 = vmatpush1.bf16.msra.mxu1 %v4473_v39  ;;  %v4484_v42 = vld [vmem:[#allocation7 + $0x4c] ss:$16 sps:$4 sm:$0xff]   ;;  %v4479_v43 = vld [vmem:[#allocation7 + $0x40] ss:$16 sps:$4 sm:$0xff]   ;;  %v4482_v4 = vld [vmem:[#allocation7 + $0x48] ss:$16 sps:$4 sm:$0xff]  }
 0x361   :  { %v878_v49 = vsel %vm537_vm10, %v872_v23, %v871_v46  ;;  %v885_v50 = vsel %vm5183_vm5, 0, %v881_v48  ;;  %2857 = vmatprep.subr.bf16.mxu1 %v4481_v41  ;;  %v4487_v13 = vld [vmem:[#allocation7 + $0x64] ss:$16 sps:$4 sm:$0xff]   ;;  %v4485_v45 = vld [vmem:[#allocation7 + $0x60] ss:$16 sps:$4 sm:$0xff]  }
 0x362   :  { %v879_v51 = vsel %vm539_vm11, %v873_v44, %v878_v49  ;;  %v890_v54 = vsel %vm889_vm8, %v885_v50, 0  ;;  %v4490_v44 = vld [vmem:[#allocation7 + $0x6c] ss:$16 sps:$4 sm:$0xff]   ;;  %v4488_v46 = vld [vmem:[#allocation7 + $0x68] ss:$16 sps:$4 sm:$0xff]   ;;  %vm5356_vm11 = vmand %vm231_vm2, %vm1503_vm9 }
 0x363   :  { %v880_v55 = vsel %vm541_vm12, %v874_v47, %v879_v51  ;;  %v895_v56 = vshll.u32 %v890_v54, 16  ;;  %v893_v62 = vshrl.u32 %v890_v54, 16  ;;  %v908_v63 = vrot.slane %v890_v54, 1  ;;  %v4493_v23 = vld [vmem:[#allocation7 + $0x84] ss:$16 sps:$4 sm:$0xff]  }
 0x364   :  { %v882_v57 = vpack.c.b16 %v880_v55, %v880_v55  ;;  %2858 = vmatpush1.bf16.msra.mxu1 %v4479_v43  ;;  %v4496_v47 = vld [vmem:[#allocation7 + $0x8c] ss:$16 sps:$4 sm:$0xff]   ;;  %v4491_v48 = vld [vmem:[#allocation7 + $0x80] ss:$16 sps:$4 sm:$0xff]   ;;  %v4494_v49 = vld [vmem:[#allocation7 + $0x88] ss:$16 sps:$4 sm:$0xff]  }
 0x365   :  { %v897_v58 = vrot.slane %v895_v56, 1  ;;  %v924_v6 = vrot.slane %v908_v63, %v5222_v7  ;;  %2859 = vmatprep.subr.bf16.mxu1 %v4487_v13  ;;  %v4499_v50 = vld [vmem:[#allocation7 + $0xa4] ss:$16 sps:$4 sm:$0xff]   ;;  %v4502_v51 = vld [vmem:[#allocation7 + $0xac] ss:$16 sps:$4 sm:$0xff]  }
 0x366   :  { %v886_v59 = vsel %vm5183_vm5, 0, %v882_v57  ;;  %v4500_v55 = vld [vmem:[#allocation7 + $0xa8] ss:$16 sps:$4 sm:$0xff]   ;;  %v4505_v56 = vld [vmem:[#allocation7 + $0xc4] ss:$16 sps:$4 sm:$0xff]  }
 0x367   :  { %v891_v0 = vsel %vm889_vm8, %v886_v59, 0  ;;  %v898_v1 = vor.u32 %v897_v58, %v893_v62  ;;  %v4508_v57 = vld [vmem:[#allocation7 + $0xcc] ss:$16 sps:$4 sm:$0xff]   ;;  %v4503_v58 = vld [vmem:[#allocation7 + $0xc0] ss:$16 sps:$4 sm:$0xff]  }
 0x368   :  { %v902_v2 = vshll.u32 %v891_v0, 16  ;;  %v909_v5 = vrot.slane %v891_v0, 1  ;;  %v900_v53 = vshrl.u32 %v891_v0, 16  ;;  %2860 = vmatpush1.bf16.msra.mxu1 %v4485_v45  ;;  %v4506_v59 = vld [vmem:[#allocation7 + $0xc8] ss:$16 sps:$4 sm:$0xff]  }
 0x369   :  { %v910_v10 = vcombine.low %v890_v54, %v898_v1  ;;  %2861 = vmatprep.subr.bf16.mxu1 %v4493_v23  ;;  %v4497_v54 = vld [vmem:[#allocation7 + $0xa0] ss:$16 sps:$4 sm:$0xff]   ;;  %v4511_v62 = vld [vmem:[#allocation7 + $0xe4] ss:$16 sps:$4 sm:$0xff]   ;;  %v4514_v63 = vld [vmem:[#allocation7 + $0xec] ss:$16 sps:$4 sm:$0xff]  }
 0x36a   :  { %v904_v61 = vrot.slane %v902_v2, 1  ;;  %v940_v8 = vrot.slane %v909_v5, %v5222_v7  ;;  %v4512_v1 = vld [vmem:[#allocation7 + $0xe8] ss:$16 sps:$4 sm:$0xff]   ;;  %v4517_v2 = vld [vmem:[#allocation7 + $0x104] ss:$16 sps:$4 sm:$0xff]  }
 0x36b   :  { %v917_v15 = vrot.slane %v910_v10, %v5222_v7  ;;  %v4520_v5 = vld [vmem:[#allocation7 + $0x10c] ss:$16 sps:$4 sm:$0xff]   ;;  %v4524_v10 = vld [vmem:[#allocation7 + $0x128] ss:$16 sps:$4 sm:$0xff]   ;;  %v990_v39 = vld [vmem:[%s5448_s6] sm:$0x3] }
 0x36c   :  { %v905_v9 = vor.u32 %v904_v61, %v900_v53  ;;  %v3967_v11 = vcombine.low %v924_v6, %v940_v8  ;;  %2862 = vmatpush1.bf16.msra.mxu1 %v4491_v48  ;;  %v4515_v53 = vld [vmem:[#allocation7 + $0x100] ss:$16 sps:$4 sm:$0xff]   ;;  %v4518_v61 = vld [vmem:[#allocation7 + $0x108] ss:$16 sps:$4 sm:$0xff]   ;;  %v4523_v6 = vld [vmem:[#allocation7 + $0x124] ss:$16 sps:$4 sm:$0xff]  }
 0x36d   :  { %2863 = vmatprep.subr.bf16.mxu1 %v4499_v50  ;;  %v4526_v8 = vld [vmem:[#allocation7 + $0x12c] ss:$16 sps:$4 sm:$0xff]  }
 0x36e   :  { %v926_v12 = vcombine.low %v891_v0, %v905_v9  ;;  %v1017_v36 = vrot.slane %v3967_v11, %v5222_v7  ;;  %v4509_v0 = vld [vmem:[#allocation7 + $0xe0] ss:$16 sps:$4 sm:$0xff]   ;;  %v4568_v37 = vld [vmem:[#allocation7 + $0x20c] ss:$16 sps:$4 sm:$0xff]  }
 0x36f   :  { %v4521_v9 = vld [vmem:[#allocation7 + $0x120] ss:$16 sps:$4 sm:$0xff]  }
 0x370   :  { %v933_v16 = vrot.slane %v926_v12, %v5222_v7  ;;  %2864 = vmatpush1.bf16.msra.mxu1 %v4497_v54  ;;  %v4527_v11 = vld [vmem:[#allocation7 + $0x140] ss:$16 sps:$4 sm:$0xff]   ;;  %v4529_v12 = vld [vmem:[#allocation7 + $0x144] ss:$16 sps:$4 sm:$0xff]  }
 0x371   :  { %2865 = vmatprep.subr.bf16.mxu1 %v4505_v56 }
 0x372   :  { %v3966_v17 = vcombine.low %v917_v15, %v933_v16  ;;  %v4530_v15 = vld [vmem:[#allocation7 + $0x148] ss:$16 sps:$4 sm:$0xff]   ;;  %v4532_v16 = vld [vmem:[#allocation7 + $0x14c] ss:$16 sps:$4 sm:$0xff]  }
 0x374   :  { %v1010_v18 = vrot.slane %v3966_v17, %v5222_v7  ;;  %2866 = vmatpush1.bf16.msra.mxu1 %v4503_v58  ;;  %v4535_v17 = vld [vmem:[#allocation7 + $0x164] ss:$16 sps:$4 sm:$0xff]  }
 0x375   :  { %2867 = vmatprep.subr.bf16.mxu1 %v4511_v62 }
 0x376   :  { %v1018_v19 = vcombine.high %v1010_v18, %v1010_v18 }
 0x378   :  { %1294 = vmatprep.mubr.bf16.mxu0 %v1018_v19  ;;  %2868 = vmatpush1.bf16.msra.mxu1 %v4509_v0  ;;  %v4533_v19 = vld [vmem:[#allocation7 + $0x160] ss:$16 sps:$4 sm:$0xff]  }
 0x379   :  { %1295 = vmatmul.mubr.bf16.vlgmr.msra.gmra.mrb[4].mxu0 %v1010_v18  ;;  %2869 = vmatprep.subr.bf16.mxu1 %v4517_v2  ;;  %v4538_v18 = vld [vmem:[#allocation7 + $0x16c] ss:$16 sps:$4 sm:$0xff]  }
 0x37a   :  { %1304 = vmatpush1.bf16.msra.mxu0 %v4443_v20  ;;  %1335 = vmatprep.mubr.bf16.mxu0 %v5020_v52  ;;  %v4461_v52 = vld [vmem:[#allocation5 + $0x160] ss:$8 sps:$4 sm:$0xff]  }
 0x37b   :  { %1305 = vmatprep.subr.bf16.mxu0 %v4448_v21  ;;  %v4536_v20 = vld [vmem:[#allocation7 + $0x168] ss:$16 sps:$4 sm:$0xff]   ;;  %v4541_v21 = vld [vmem:[#allocation7 + $0x184] ss:$16 sps:$4 sm:$0xff]  }
 0x37c   :  { %2870 = vmatpush1.bf16.msra.mxu1 %v4515_v53 }
 0x37d   :  { %2871 = vmatprep.subr.bf16.mxu1 %v4523_v6 }
 0x37e   :  { %1306 = vmatpush1.bf16.msra.mxu0 %v4446_v22  ;;  %v4544_v22 = vld [vmem:[#allocation7 + $0x18c] ss:$16 sps:$4 sm:$0xff]  }
 0x37f   :  { %1307 = vmatprep.subr.bf16.mxu0 %v4451_v60  ;;  %v4539_v60 = vld [vmem:[#allocation7 + $0x180] ss:$16 sps:$4 sm:$0xff]  }
 0x380   :  { %2872 = vmatpush1.bf16.msra.mxu1 %v4521_v9 }
 0x381   :  { %2873 = vmatprep.subr.bf16.mxu1 %v4529_v12 }
 0x382   :  { %1308 = vmatpush1.bf16.msra.mxu0 %v4449_v24  ;;  %v4542_v24 = vld [vmem:[#allocation7 + $0x188] ss:$16 sps:$4 sm:$0xff]  }
 0x383   :  { %1309 = vmatprep.subr.bf16.mxu0 %v4454_v25  ;;  %v4547_v25 = vld [vmem:[#allocation7 + $0x1a4] ss:$16 sps:$4 sm:$0xff]  }
 0x384   :  { %2874 = vmatpush1.bf16.msra.mxu1 %v4527_v11 }
 0x385   :  { %2875 = vmatprep.subr.bf16.mxu1 %v4535_v17 }
 0x386   :  { %1310 = vmatpush1.bf16.msra.mxu0 %v4452_v26  ;;  %v4550_v26 = vld [vmem:[#allocation7 + $0x1ac] ss:$16 sps:$4 sm:$0xff]  }
 0x387   :  { %1311 = vmatprep.subr.bf16.mxu0 %v4457_v27  ;;  %v4545_v27 = vld [vmem:[#allocation7 + $0x1a0] ss:$16 sps:$4 sm:$0xff]  }
 0x388   :  { %2876 = vmatpush1.bf16.msra.mxu1 %v4533_v19 }
 0x389   :  { %2877 = vmatprep.subr.bf16.mxu1 %v4541_v21 }
 0x38a   :  { %1312 = vmatpush1.bf16.msra.mxu0 %v4455_v28  ;;  %v4548_v28 = vld [vmem:[#allocation7 + $0x1a8] ss:$16 sps:$4 sm:$0xff]  }
 0x38b   :  { %1313 = vmatprep.subr.bf16.mxu0 %v4460_v29  ;;  %v4553_v29 = vld [vmem:[#allocation7 + $0x1c4] ss:$16 sps:$4 sm:$0xff]  }
 0x38c   :  { %2878 = vmatpush1.bf16.msra.mxu1 %v4539_v60 }
 0x38d   :  { %2879 = vmatprep.subr.bf16.mxu1 %v4547_v25 }
 0x38e   :  { %1314 = vmatpush1.bf16.msra.mxu0 %v4458_v30  ;;  %v4556_v30 = vld [vmem:[#allocation7 + $0x1cc] ss:$16 sps:$4 sm:$0xff]  }
 0x38f   :  { %1315 = vmatprep.subr.bf16.mxu0 %v4463_v31  ;;  %v4551_v31 = vld [vmem:[#allocation7 + $0x1c0] ss:$16 sps:$4 sm:$0xff]  }
 0x390   :  { %2880 = vmatpush1.bf16.msra.mxu1 %v4545_v27 }
 0x391   :  { %2881 = vmatprep.subr.bf16.mxu1 %v4553_v29 }
 0x392   :  { %1316 = vmatpush1.bf16.msra.mxu0 %v4461_v52  ;;  %v4554_v52 = vld [vmem:[#allocation7 + $0x1c8] ss:$16 sps:$4 sm:$0xff]  }
 0x393   :  { %1317 = vmatprep.subr.bf16.mxu0 %v4466_v32  ;;  %v4559_v32 = vld [vmem:[#allocation7 + $0x1e4] ss:$16 sps:$4 sm:$0xff]  }
 0x394   :  { %2882 = vmatpush1.bf16.msra.mxu1 %v4551_v31 }
 0x395   :  { %2883 = vmatprep.subr.bf16.mxu1 %v4559_v32 }
 0x396   :  { %1318 = vmatpush1.bf16.msra.mxu0 %v4464_v33  ;;  %v4562_v33 = vld [vmem:[#allocation7 + $0x1ec] ss:$16 sps:$4 sm:$0xff]  }
 0x397   :  { %2976 = vmatprep.subr.bf16.mxu0 %v4472_v34  ;;  %v4557_v34 = vld [vmem:[#allocation7 + $0x1e0] ss:$16 sps:$4 sm:$0xff]  }
 0x398   :  { %2884 = vmatpush1.bf16.msra.mxu1 %v4557_v34 }
 0x399   :  { %1336 = vmatmul.mubr.bf16.vlgmr.msra.gmra.mrb[4].mxu0 %v1017_v36  ;;  %v4565_v36 = vld [vmem:[#allocation7 + $0x204] ss:$16 sps:$4 sm:$0xff]  }
 0x39a   :  { %2977 = vmatpush1.bf16.msra.mxu0 %v4470_v35  ;;  %v4560_v35 = vld [vmem:[#allocation7 + $0x1e8] ss:$16 sps:$4 sm:$0xff]   ;;  %2894 = vmatprep.subr.bf16.mxu1 %v4565_v36 }
 0x39b   :  { %2978 = vmatprep.subr.bf16.mxu0 %v4478_v38  ;;  %v5329_v38 = vsub.s32 0, %v5213_v3 }
 0x39d   :  { %v995_v41 = vrot.slane %v990_v39, %v5329_v38 }
 0x39e   :  { %2979 = vmatpush1.bf16.msra.mxu0 %v4476_v40  ;;  %v5335_v40 = vsub.s32 1, %v5213_v3 }
 0x39f   :  { %2980 = vmatprep.subr.bf16.mxu0 %v4484_v42 }
 0x3a0   :  { %v999_v42 = vrot.slane %v990_v39, %v5335_v40 }
 0x3a2   :  { %2981 = vmatpush1.bf16.msra.mxu0 %v4482_v4 }
 0x3a3   :  { %2982 = vmatprep.subr.bf16.mxu0 %v4490_v44 }
 0x3a6   :  { %2983 = vmatpush1.bf16.msra.mxu0 %v4488_v46 }
 0x3a7   :  { %2984 = vmatprep.subr.bf16.mxu0 %v4496_v47 }
 0x3aa   :  { %2985 = vmatpush1.bf16.msra.mxu0 %v4494_v49 }
 0x3ab   :  { %2986 = vmatprep.subr.bf16.mxu0 %v4502_v51 }
 0x3ae   :  { %2987 = vmatpush1.bf16.msra.mxu0 %v4500_v55 }
 0x3af   :  { %2988 = vmatprep.subr.bf16.mxu0 %v4508_v57 }
 0x3b2   :  { %2989 = vmatpush1.bf16.msra.mxu0 %v4506_v59 }
 0x3b3   :  { %2990 = vmatprep.subr.bf16.mxu0 %v4514_v63 }
 0x3b6   :  { %2991 = vmatpush1.bf16.msra.mxu0 %v4512_v1 }
 0x3b7   :  { %2992 = vmatprep.subr.bf16.mxu0 %v4520_v5 }
 0x3ba   :  { %2993 = vmatpush1.bf16.msra.mxu0 %v4518_v61 }
 0x3bb   :  { %2994 = vmatprep.subr.bf16.mxu0 %v4526_v8 }
 0x3be   :  { %2995 = vmatpush1.bf16.msra.mxu0 %v4524_v10 }
 0x3bf   :  { %2996 = vmatprep.subr.bf16.mxu0 %v4532_v16 }
 0x3c2   :  { %2997 = vmatpush1.bf16.msra.mxu0 %v4530_v15 }
 0x3c3   :  { %2998 = vmatprep.subr.bf16.mxu0 %v4538_v18 }
 0x3c6   :  { %2999 = vmatpush1.bf16.msra.mxu0 %v4536_v20 }
 0x3c7   :  { %3000 = vmatprep.subr.bf16.mxu0 %v4544_v22 }
 0x3ca   :  { %3001 = vmatpush1.bf16.msra.mxu0 %v4542_v24 }
 0x3cb   :  { %3002 = vmatprep.subr.bf16.mxu0 %v4550_v26 }
 0x3ce   :  { %3003 = vmatpush1.bf16.msra.mxu0 %v4548_v28 }
 0x3cf   :  { %3004 = vmatprep.subr.bf16.mxu0 %v4556_v30 }
 0x3d2   :  { %3005 = vmatpush1.bf16.msra.mxu0 %v4554_v52 }
 0x3d3   :  { %3006 = vmatprep.subr.bf16.mxu0 %v4562_v33 }
 0x3d6   :  { %3007 = vmatpush1.bf16.msra.mxu0 %v4560_v35 }
 0x3d7   :  { %3017 = vmatprep.subr.bf16.mxu0 %v4568_v37 }
 0x46c   :  { %v1337_v43 = vpop.f32.mrb[4].mxu0 }
 0x46d   :  { %v4330_v4 = vadd.f32 %v1337_v43, %v995_v41  ;;  %v1339_v13 = vpop.f32.mrb[5].mxu0 }
 0x46e   :  { %v4331_v44 = vadd.f32 %v1339_v13, %v999_v42  ;;  %v1341_v45 = vpop.f32.mrb[6].mxu0 }
 0x46f   :  { %v1344_v46 = vmax.f32 %v4330_v4, 0.0  ;;  %v1342_v23 = vpop.f32.mrb[7].mxu0 }
 0x470   :  { %v1345_v47 = vmax.f32 %v4331_v44, 0.0 }
 0x472   :  { %v1348_v48 = vcombine.low %v1344_v46, %v1345_v47  ;;  %v1349_v49 = vcombine.high %v1344_v46, %v1345_v47 }
 0x474   :  { %v1356_v50 = vrot.slane %v1348_v48, %v5222_v7  ;;  %v1363_v51 = vrot.slane %v1349_v49, %v5222_v7 }
 0x476   :  { %v1364_v54 = vcombine.high %v1356_v50, %v1356_v50  ;;  %v1365_v55 = vcombine.high %v1363_v51, %v1363_v51  ;;  %v1372_v56 = vrot.slane %v1356_v50, %v5222_v7  ;;  %v1388_v57 = vrot.slane %v1363_v51, %v5222_v7 }
 0x478   :  { %v1373_v58 = vcombine.high %v1372_v56, %v1372_v56  ;;  %v1380_v59 = vrot.slane %v1364_v54, %v5222_v7  ;;  %v1389_v62 = vcombine.high %v1388_v57, %v1388_v57  ;;  %v1396_v63 = vrot.slane %v1365_v55, %v5222_v7 }
 0x479   :  { %v1406_v0 = vsel %vm231_vm2, %v1372_v56, -inf  ;;  %v1434_v1 = vsel %vm231_vm2, %v1388_v57, -inf }
 0x47a   :  { %v1381_v2 = vcombine.high %v1380_v59, %v1380_v59  ;;  %v1397_v5 = vcombine.high %v1396_v63, %v1396_v63  ;;  %v1407_v53 = vrot.slane %v1406_v0, 4  ;;  %v1413_v61 = vsel %vm231_vm2, %v1373_v58, -inf }
 0x47b   :  { %v1414_v6 = vrot.slane %v1413_v61, 4  ;;  %v1420_v8 = vsel %vm231_vm2, %v1380_v59, -inf  ;;  %v1435_v9 = vrot.slane %v1434_v1, 4  ;;  %v1441_v10 = vsel %vm231_vm2, %v1389_v62, -inf }
 0x47c   :  { %v1408_v11 = vmax.f32 %v1406_v0, %v1407_v53  ;;  %v1421_v12 = vrot.slane %v1420_v8, 4  ;;  %v1427_v15 = vsel %vm231_vm2, %v1381_v2, -inf  ;;  %v1442_v16 = vrot.slane %v1441_v10, 4 }
 0x47d   :  { %v1415_v17 = vmax.f32 %v1413_v61, %v1414_v6  ;;  %v1428_v18 = vrot.slane %v1427_v15, 4  ;;  %v1436_v19 = vmax.f32 %v1434_v1, %v1435_v9  ;;  %v1448_v20 = vsel %vm231_vm2, %v1396_v63, -inf }
 0x47e   :  { %v1409_v21 = vrot.slane %v1408_v11, 2  ;;  %v1422_v22 = vmax.f32 %v1420_v8, %v1421_v12  ;;  %v1443_v60 = vmax.f32 %v1441_v10, %v1442_v16  ;;  %v1449_v24 = vrot.slane %v1448_v20, 4 }
 0x47f   :  { %v1416_v25 = vrot.slane %v1415_v17, 2  ;;  %v1429_v26 = vmax.f32 %v1427_v15, %v1428_v18  ;;  %v1437_v27 = vrot.slane %v1436_v19, 2  ;;  %v1455_v28 = vsel %vm231_vm2, %v1397_v5, -inf }
 0x480   :  { %v1410_v29 = vmax.f32 %v1408_v11, %v1409_v21  ;;  %v1423_v30 = vrot.slane %v1422_v22, 2  ;;  %v1444_v31 = vrot.slane %v1443_v60, 2  ;;  %v1450_v52 = vmax.f32 %v1448_v20, %v1449_v24 }
 0x481   :  { %v1417_v32 = vmax.f32 %v1415_v17, %v1416_v25  ;;  %v1430_v33 = vrot.slane %v1429_v26, 2  ;;  %v1438_v34 = vmax.f32 %v1436_v19, %v1437_v27  ;;  %v1456_v35 = vrot.slane %v1455_v28, 4 }
 0x482   :  { %v1411_v36 = vrot.slane %v1410_v29, 1  ;;  %v1424_v37 = vmax.f32 %v1422_v22, %v1423_v30  ;;  %v1445_v39 = vmax.f32 %v1443_v60, %v1444_v31  ;;  %v1451_v41 = vrot.slane %v1450_v52, 2 }
 0x483   :  { %v1418_v42 = vrot.slane %v1417_v32, 1  ;;  %v1431_v43 = vmax.f32 %v1429_v26, %v1430_v33  ;;  %v1439_v4 = vrot.slane %v1438_v34, 1  ;;  %v1457_v13 = vmax.f32 %v1455_v28, %v1456_v35 }
 0x484   :  { %v1412_v44 = vmax.f32 %v1410_v29, %v1411_v36  ;;  %v1425_v45 = vrot.slane %v1424_v37, 1  ;;  %v1446_v46 = vrot.slane %v1445_v39, 1  ;;  %v1452_v23 = vmax.f32 %v1450_v52, %v1451_v41 }
 0x485   :  { %v1419_v47 = vmax.f32 %v1417_v32, %v1418_v42  ;;  %v1432_v48 = vrot.slane %v1431_v43, 1  ;;  %v1440_v49 = vmax.f32 %v1438_v34, %v1439_v4  ;;  %v1458_v50 = vrot.slane %v1457_v13, 2 }
 0x486   :  { %v1426_v51 = vmax.f32 %v1424_v37, %v1425_v45  ;;  %v1453_v54 = vrot.slane %v1452_v23, 1  ;;  %v1462_v55 = vpack.c.bf16 %v1412_v44, %v1412_v44  ;;  %v1447_v57 = vmax.f32 %v1445_v39, %v1446_v46 }
 0x487   :  { %v1433_v56 = vmax.f32 %v1431_v43, %v1432_v48  ;;  %v1459_v58 = vmax.f32 %v1457_v13, %v1458_v50  ;;  %v1463_v59 = vpack.c.bf16 %v1419_v47, %v1419_v47  ;;  %v1466_v0 = vpack.c.bf16 %v1440_v49, %v1440_v49 }
 0x488   :  { %v1454_v62 = vmax.f32 %v1452_v23, %v1453_v54  ;;  %v1464_v63 = vpack.c.bf16 %v1426_v51, %v1426_v51  ;;  %v1478_v53 = vunpack.c.l.b16 %v1462_v55  ;;  %v1467_v8 = vpack.c.bf16 %v1447_v57, %v1447_v57 }
 0x489   :  { %v1460_v1 = vrot.slane %v1459_v58, 1  ;;  %v1465_v2 = vpack.c.bf16 %v1433_v56, %v1433_v56  ;;  %v1479_v9 = vunpack.c.l.b16 %v1463_v59  ;;  %v1482_v11 = vunpack.c.l.b16 %v1466_v0 }
 0x48a   :  { %v1468_v5 = vpack.c.bf16 %v1454_v62, %v1454_v62  ;;  %v1480_v61 = vunpack.c.l.b16 %v1464_v63  ;;  %v5022_v16 = vmov 1966171168   ;;  %v1483_v24 = vunpack.c.l.b16 %v1467_v8 }
 0x48b   :  { %v1461_v6 = vmax.f32 %v1459_v58, %v1460_v1  ;;  %v1481_v10 = vunpack.c.l.b16 %v1465_v2  ;;  %v1549_v17 = vunpack.c.l.s4 %v5022_v16 }
 0x48c   :  { %v1484_v12 = vunpack.c.l.b16 %v1468_v5  ;;  %v1486_v15 = vsel %vm537_vm10, %v1480_v61, %v1478_v53 }
 0x48d   :  { %v1469_v18 = vpack.c.bf16 %v1461_v6, %v1461_v6  ;;  %v1487_v19 = vsel %vm537_vm10, %v1481_v10, %v1479_v9  ;;  %v1490_v20 = vpack.c.b16 %v1486_v15, %v1486_v15  ;;  %v1550_v30 = vunpack.c.0.s8 %v1549_v17 }
 0x48e   :  { %v1488_v22 = vsel %vm537_vm10, %v1484_v12, %v1482_v11  ;;  %v1491_v60 = vpack.c.b16 %v1487_v19, %v1487_v19 }
 0x48f   :  { %v1485_v25 = vunpack.c.l.b16 %v1469_v18  ;;  %v1492_v26 = vpack.c.b16 %v1488_v22, %v1488_v22  ;;  %v1498_v27 = vsel %vm5183_vm5, 0, %v1490_v20  ;;  %v1553_v42 = vsub.s32 %v1550_v30, %v5213_v3  ;;  %v4571_v30 = vld [vmem:[#allocation7 + $0x224] ss:$16 sps:$4 sm:$0xff]  }
 0x490   :  { %v1499_v28 = vsel %vm5183_vm5, 0, %v1491_v60  ;;  %v1505_v29 = vsel %vm5356_vm11, %v1498_v27, 0  ;;  %v4566_v27 = vld [vmem:[#allocation7 + $0x208] ss:$16 sps:$4 sm:$0xff]  }
 0x491   :  { %v1489_v31 = vsel %vm537_vm10, %v1485_v25, %v1483_v24  ;;  %v1500_v52 = vsel %vm5183_vm5, 0, %v1492_v26  ;;  %v1506_v32 = vsel %vm5356_vm11, %v1499_v28, 0  ;;  %v1512_v35 = vshll.u32 %v1505_v29, 16  ;;  %v4563_v26 = vld [vmem:[#allocation7 + $0x200] ss:$16 sps:$4 sm:$0xff]  }
 0x492   :  { %v1493_v33 = vpack.c.b16 %v1489_v31, %v1489_v31  ;;  %v1507_v34 = vsel %vm5356_vm11, %v1500_v52, 0  ;;  %v1519_v36 = vshll.u32 %v1506_v32, 16  ;;  %v1542_v43 = vrot.slane %v1506_v32, 1  ;;  %v4574_v31 = vld [vmem:[#allocation7 + $0x22c] ss:$16 sps:$4 sm:$0xff]  }
 0x493   :  { %v1526_v37 = vshll.u32 %v1507_v34, 16  ;;  %v1514_v41 = vrot.slane %v1512_v35, 1  ;;  %v1510_v13 = vshrl.u32 %v1505_v29, 16  ;;  %v1517_v44 = vshrl.u32 %v1506_v32, 16  ;;  %v4569_v52 = vld [vmem:[#allocation7 + $0x220] ss:$16 sps:$4 sm:$0xff]  }
 0x494   :  { %v1501_v39 = vsel %vm5183_vm5, 0, %v1493_v33  ;;  %v1521_v45 = vrot.slane %v1519_v36, 1  ;;  %v1545_v47 = vcombine.low %v1505_v29, %v1506_v32  ;;  %v1541_v48 = vrot.slane %v1505_v29, 1  ;;  %v4572_v32 = vld [vmem:[#allocation7 + $0x228] ss:$16 sps:$4 sm:$0xff]  }
 0x495   :  { %v1508_v4 = vsel %vm5356_vm11, %v1501_v39, 0  ;;  %v1528_v46 = vrot.slane %v1526_v37, 1  ;;  %v1515_v49 = vor.u32 %v1514_v41, %v1510_v13  ;;  %v1543_v51 = vrot.slane %v1507_v34, 1  ;;  %v4577_v33 = vld [vmem:[#allocation7 + $0x244] ss:$16 sps:$4 sm:$0xff]  }
 0x496   :  { %v1533_v23 = vshll.u32 %v1508_v4, 16  ;;  %v1522_v50 = vor.u32 %v1521_v45, %v1517_v44  ;;  %v1544_v54 = vrot.slane %v1508_v4, 1  ;;  %v1524_v14 = vshrl.u32 %v1507_v34, 16  ;;  %v4575_v35 = vld [vmem:[#allocation7 + $0x240] ss:$16 sps:$4 sm:$0xff]  }
 0x497   :  { %v1531_v55 = vshrl.u32 %v1508_v4, 16  ;;  %v1547_v57 = vcombine.low %v1541_v48, %v1542_v43  ;;  %v1585_v0 = vcombine.low %v1507_v34, %v1508_v4  ;;  %v1554_v2 = vrot.slane %v1545_v47, %v1553_v42  ;;  %v4580_v34 = vld [vmem:[#allocation7 + $0x24c] ss:$16 sps:$4 sm:$0xff]   ;;  %v4578_v36 = vld [vmem:[#allocation7 + $0x248] ss:$16 sps:$4 sm:$0xff]  }
 0x498   :  { %v1535_v56 = vrot.slane %v1533_v23, 1  ;;  %v1546_v58 = vcombine.low %v1515_v49, %v1522_v50  ;;  %v1587_v59 = vcombine.low %v1543_v51, %v1544_v54  ;;  %v1529_v62 = vor.u32 %v1528_v46, %v1524_v14  ;;  %v4583_v37 = vld [vmem:[#allocation7 + $0x264] ss:$16 sps:$4 sm:$0xff]   ;;  %v4586_v39 = vld [vmem:[#allocation7 + $0x26c] ss:$16 sps:$4 sm:$0xff]  }
 0x499   :  { %v1568_v1 = vrot.slane %v1547_v57, %v1553_v42  ;;  %v1594_v10 = vrot.slane %v1585_v0, %v1553_v42  ;;  %v4581_v41 = vld [vmem:[#allocation7 + $0x260] ss:$16 sps:$4 sm:$0xff]   ;;  %v4589_v43 = vld [vmem:[#allocation7 + $0x284] ss:$16 sps:$4 sm:$0xff]   ;;  %v4592_v4 = vld [vmem:[#allocation7 + $0x28c] ss:$16 sps:$4 sm:$0xff]  }
 0x49a   :  { %v1536_v63 = vor.u32 %v1535_v56, %v1531_v55  ;;  %v1561_v5 = vrot.slane %v1546_v58, %v1553_v42  ;;  %v1608_v53 = vrot.slane %v1587_v59, %v1553_v42  ;;  %v4587_v13 = vld [vmem:[#allocation7 + $0x280] ss:$16 sps:$4 sm:$0xff]   ;;  %v4590_v44 = vld [vmem:[#allocation7 + $0x288] ss:$16 sps:$4 sm:$0xff]   ;;  %v4595_v45 = vld [vmem:[#allocation7 + $0x2a4] ss:$16 sps:$4 sm:$0xff]  }
 0x49b   :  { %v1583_v6 = vrot.slane %v1568_v1, %v1553_v42  ;;  %v4598_v46 = vld [vmem:[#allocation7 + $0x2ac] ss:$16 sps:$4 sm:$0xff]   ;;  %v4593_v23 = vld [vmem:[#allocation7 + $0x2a0] ss:$16 sps:$4 sm:$0xff]   ;;  %v4596_v47 = vld [vmem:[#allocation7 + $0x2a8] ss:$16 sps:$4 sm:$0xff]  }
 0x49c   :  { %v1586_v61 = vcombine.low %v1529_v62, %v1536_v63  ;;  %v1569_v8 = vcombine.low %v1554_v2, %v1561_v5  ;;  %v1623_v9 = vrot.slane %v1608_v53, %v1553_v42  ;;  %v4601_v48 = vld [vmem:[#allocation7 + $0x2c4] ss:$16 sps:$4 sm:$0xff]   ;;  %v4604_v49 = vld [vmem:[#allocation7 + $0x2cc] ss:$16 sps:$4 sm:$0xff]   ;;  %v4599_v50 = vld [vmem:[#allocation7 + $0x2c0] ss:$16 sps:$4 sm:$0xff]  }
 0x49d   :  { %v4602_v51 = vld [vmem:[#allocation7 + $0x2c8] ss:$16 sps:$4 sm:$0xff]   ;;  %v4607_v54 = vld [vmem:[#allocation7 + $0x2e4] ss:$16 sps:$4 sm:$0xff]   ;;  %v4610_v14 = vld [vmem:[#allocation7 + $0x2ec] ss:$16 sps:$4 sm:$0xff]  }
 0x49e   :  { %v1601_v11 = vrot.slane %v1586_v61, %v1553_v42  ;;  %v4017_v12 = vcombine.low %v1583_v6, %v1623_v9  ;;  %v1576_v15 = vrot.slane %v1569_v8, %v1553_v42  ;;  %v4605_v55 = vld [vmem:[#allocation7 + $0x2e0] ss:$16 sps:$4 sm:$0xff]   ;;  %v4608_v56 = vld [vmem:[#allocation7 + $0x2e8] ss:$16 sps:$4 sm:$0xff]   ;;  %v4613_v57 = vld [vmem:[#allocation7 + $0x304] ss:$16 sps:$4 sm:$0xff]  }
 0x49f   :  { %v4616_v58 = vld [vmem:[#allocation7 + $0x30c] ss:$16 sps:$4 sm:$0xff]   ;;  %v4611_v59 = vld [vmem:[#allocation7 + $0x300] ss:$16 sps:$4 sm:$0xff]   ;;  %v4614_v62 = vld [vmem:[#allocation7 + $0x308] ss:$16 sps:$4 sm:$0xff]  }
 0x4a0   :  { %v1609_v16 = vcombine.low %v1594_v10, %v1601_v11  ;;  %v1854_v17 = vrot.slane %v4017_v12, %v1553_v42  ;;  %v4619_v63 = vld [vmem:[#allocation7 + $0x324] ss:$16 sps:$4 sm:$0xff]   ;;  %v4622_v0 = vld [vmem:[#allocation7 + $0x32c] ss:$16 sps:$4 sm:$0xff]   ;;  %v4617_v1 = vld [vmem:[#allocation7 + $0x320] ss:$16 sps:$4 sm:$0xff]  }
 0x4a1   :  { %v4620_v2 = vld [vmem:[#allocation7 + $0x328] ss:$16 sps:$4 sm:$0xff]   ;;  %v4625_v5 = vld [vmem:[#allocation7 + $0x344] ss:$16 sps:$4 sm:$0xff]   ;;  %v4628_v53 = vld [vmem:[#allocation7 + $0x34c] ss:$16 sps:$4 sm:$0xff]  }
 0x4a2   :  { %v1616_v18 = vrot.slane %v1609_v16, %v1553_v42  ;;  %v1856_v19 = vcombine.high %v1854_v17, %v1854_v17  ;;  %v5379_v20 = vrot.slane %v1854_v17, %v1553_v42  ;;  %v4623_v61 = vld [vmem:[#allocation7 + $0x340] ss:$16 sps:$4 sm:$0xff]   ;;  %v4626_v6 = vld [vmem:[#allocation7 + $0x348] ss:$16 sps:$4 sm:$0xff]   ;;  %v4631_v8 = vld [vmem:[#allocation7 + $0x364] ss:$16 sps:$4 sm:$0xff]  }
 0x4a3   :  { %v4634_v9 = vld [vmem:[#allocation7 + $0x36c] ss:$16 sps:$4 sm:$0xff]   ;;  %v4629_v10 = vld [vmem:[#allocation7 + $0x360] ss:$16 sps:$4 sm:$0xff]   ;;  %v4632_v11 = vld [vmem:[#allocation7 + $0x368] ss:$16 sps:$4 sm:$0xff]  }
 0x4a4   :  { %v4016_v21 = vcombine.low %v1576_v15, %v1616_v18  ;;  %v5381_v22 = vrot.slane %v1856_v19, %v1553_v42  ;;  %v4637_v12 = vld [vmem:[#allocation7 + $0x384] ss:$16 sps:$4 sm:$0xff]   ;;  %v4640_v15 = vld [vmem:[#allocation7 + $0x38c] ss:$16 sps:$4 sm:$0xff]   ;;  %v4635_v16 = vld [vmem:[#allocation7 + $0x380] ss:$16 sps:$4 sm:$0xff]  }
 0x4a5   :  { %v4638_v17 = vld [vmem:[#allocation7 + $0x388] ss:$16 sps:$4 sm:$0xff]   ;;  %v4643_v18 = vld [vmem:[#allocation7 + $0x3a4] ss:$16 sps:$4 sm:$0xff]   ;;  %v4646_v19 = vld [vmem:[#allocation7 + $0x3ac] ss:$16 sps:$4 sm:$0xff]  }
 0x4a6   :  { %v1847_v60 = vrot.slane %v4016_v21, %v1553_v42  ;;  %v4641_v21 = vld [vmem:[#allocation7 + $0x3a0] ss:$16 sps:$4 sm:$0xff]  }
 0x4a8   :  { %v1855_v24 = vcombine.high %v1847_v60, %v1847_v60  ;;  %v5383_v28 = vrot.slane %v1847_v60, %v1553_v42  ;;  %v4644_v60 = vld [vmem:[#allocation7 + $0x3a8] ss:$16 sps:$4 sm:$0xff]  }
 0x4aa   :  { %v1877_v25 = vrot.slane %v1855_v24, %v1553_v42  ;;  %v4584_v42 = vld [vmem:[#allocation7 + $0x268] ss:$16 sps:$4 sm:$0xff]   ;;  %v4649_v24 = vld [vmem:[#allocation7 + $0x3c4] ss:$16 sps:$4 sm:$0xff]  }
 0x4ac   :  { %2885 = vmatprep.mubr.bf16.mxu1 %v1877_v25  ;;  %3008 = vmatprep.mubr.bf16.mxu0 %v1877_v25  ;;  %v1886_v29 = vcombine.high %v1877_v25, %v1877_v25  ;;  %v4652_v25 = vld [vmem:[#allocation7 + $0x3cc] ss:$16 sps:$4 sm:$0xff]  }
 0x4ad   :  { %2886 = vmatmul.mubr.bf16.vlgmr.msra.gmra.mrb[4].mxu1 %v5383_v28  ;;  %3009 = vmatmul.mubr.bf16.vlgmr.msra.gmra.mrb[8].mxu0 %v5383_v28 }
 0x4ae   :  { %2895 = vmatpush1.bf16.msra.mxu1 %v4563_v26  ;;  %3018 = vmatpush1.bf16.msra.mxu0 %v4566_v27  ;;  %v4647_v26 = vld [vmem:[#allocation7 + $0x3c0] ss:$16 sps:$4 sm:$0xff]   ;;  %v4650_v27 = vld [vmem:[#allocation7 + $0x3c8] ss:$16 sps:$4 sm:$0xff]  }
 0x4af   :  { %2926 = vmatprep.mubr.bf16.mxu1 %v1886_v29  ;;  %3049 = vmatprep.mubr.bf16.mxu0 %v1886_v29  ;;  %v4655_v29 = vld [vmem:[#allocation7 + $0x3e4] ss:$16 sps:$4 sm:$0xff]  }
 0x4b0   :  { %2896 = vmatprep.subr.bf16.mxu1 %v4571_v30  ;;  %3019 = vmatprep.subr.bf16.mxu0 %v4574_v31  ;;  %v4658_v30 = vld [vmem:[#allocation7 + $0x3ec] ss:$16 sps:$4 sm:$0xff]   ;;  %v4653_v31 = vld [vmem:[#allocation7 + $0x3e0] ss:$16 sps:$4 sm:$0xff]  }
 0x4b2   :  { %2897 = vmatpush1.bf16.msra.mxu1 %v4569_v52  ;;  %3020 = vmatpush1.bf16.msra.mxu0 %v4572_v32  ;;  %v4656_v52 = vld [vmem:[#allocation7 + $0x3e8] ss:$16 sps:$4 sm:$0xff]   ;;  %v4661_v32 = vld [vmem:[#allocation7 + $0x404] ss:$16 sps:$4 sm:$0xff]  }
 0x4b3   :  { %2898 = vmatprep.subr.bf16.mxu1 %v4577_v33  ;;  %3021 = vmatprep.subr.bf16.mxu0 %v4580_v34  ;;  %v4664_v33 = vld [vmem:[#allocation7 + $0x40c] ss:$16 sps:$4 sm:$0xff]   ;;  %v4659_v34 = vld [vmem:[#allocation7 + $0x400] ss:$16 sps:$4 sm:$0xff]  }
 0x4b6   :  { %2899 = vmatpush1.bf16.msra.mxu1 %v4575_v35  ;;  %3022 = vmatpush1.bf16.msra.mxu0 %v4578_v36  ;;  %v1885_v35 = vcombine.high %v5383_v28, %v5383_v28  ;;  %v4662_v36 = vld [vmem:[#allocation7 + $0x408] ss:$16 sps:$4 sm:$0xff]   ;;  %v4671_v28 = vld [vmem:[#allocation7 + $0x440] ss:$16 sps:$4 sm:$0xff]  }
 0x4b7   :  { %2900 = vmatprep.subr.bf16.mxu1 %v4583_v37  ;;  %3023 = vmatprep.subr.bf16.mxu0 %v4586_v39  ;;  %v4667_v37 = vld [vmem:[#allocation7 + $0x424] ss:$16 sps:$4 sm:$0xff]   ;;  %v4670_v39 = vld [vmem:[#allocation7 + $0x42c] ss:$16 sps:$4 sm:$0xff]  }
 0x4ba   :  { %2901 = vmatpush1.bf16.msra.mxu1 %v4581_v41  ;;  %3024 = vmatpush1.bf16.msra.mxu0 %v4584_v42  ;;  %v4665_v41 = vld [vmem:[#allocation7 + $0x420] ss:$16 sps:$4 sm:$0xff]   ;;  %v4668_v42 = vld [vmem:[#allocation7 + $0x428] ss:$16 sps:$4 sm:$0xff]  }
 0x4bb   :  { %2902 = vmatprep.subr.bf16.mxu1 %v4589_v43  ;;  %3025 = vmatprep.subr.bf16.mxu0 %v4592_v4  ;;  %v4673_v43 = vld [vmem:[#allocation7 + $0x444] ss:$16 sps:$4 sm:$0xff]   ;;  %v4676_v4 = vld [vmem:[#allocation7 + $0x44c] ss:$16 sps:$4 sm:$0xff]  }
 0x4be   :  { %2903 = vmatpush1.bf16.msra.mxu1 %v4587_v13  ;;  %3026 = vmatpush1.bf16.msra.mxu0 %v4590_v44  ;;  %v4674_v13 = vld [vmem:[#allocation7 + $0x448] ss:$16 sps:$4 sm:$0xff]   ;;  %v4679_v44 = vld [vmem:[#allocation7 + $0x464] ss:$16 sps:$4 sm:$0xff]  }
 0x4bf   :  { %2904 = vmatprep.subr.bf16.mxu1 %v4595_v45  ;;  %3027 = vmatprep.subr.bf16.mxu0 %v4598_v46  ;;  %v4682_v45 = vld [vmem:[#allocation7 + $0x46c] ss:$16 sps:$4 sm:$0xff]   ;;  %v4677_v46 = vld [vmem:[#allocation7 + $0x460] ss:$16 sps:$4 sm:$0xff]  }
 0x4c2   :  { %2905 = vmatpush1.bf16.msra.mxu1 %v4593_v23  ;;  %3028 = vmatpush1.bf16.msra.mxu0 %v4596_v47  ;;  %v4680_v23 = vld [vmem:[#allocation7 + $0x468] ss:$16 sps:$4 sm:$0xff]   ;;  %v4685_v47 = vld [vmem:[#allocation7 + $0x484] ss:$16 sps:$4 sm:$0xff]  }
 0x4c3   :  { %2906 = vmatprep.subr.bf16.mxu1 %v4601_v48  ;;  %3029 = vmatprep.subr.bf16.mxu0 %v4604_v49  ;;  %v4683_v48 = vld [vmem:[#allocation7 + $0x480] ss:$16 sps:$4 sm:$0xff]   ;;  %v4686_v49 = vld [vmem:[#allocation7 + $0x488] ss:$16 sps:$4 sm:$0xff]  }
 0x4c6   :  { %2907 = vmatpush1.bf16.msra.mxu1 %v4599_v50  ;;  %3030 = vmatpush1.bf16.msra.mxu0 %v4602_v51  ;;  %v4691_v50 = vld [vmem:[#allocation7 + $0x4a4] ss:$16 sps:$4 sm:$0xff]   ;;  %v4694_v51 = vld [vmem:[#allocation7 + $0x4ac] ss:$16 sps:$4 sm:$0xff]  }
 0x4c7   :  { %2908 = vmatprep.subr.bf16.mxu1 %v4607_v54  ;;  %3031 = vmatprep.subr.bf16.mxu0 %v4610_v14  ;;  %v4689_v54 = vld [vmem:[#allocation7 + $0x4a0] ss:$16 sps:$4 sm:$0xff]   ;;  %v4692_v14 = vld [vmem:[#allocation7 + $0x4a8] ss:$16 sps:$4 sm:$0xff]  }
 0x4ca   :  { %2909 = vmatpush1.bf16.msra.mxu1 %v4605_v55  ;;  %3032 = vmatpush1.bf16.msra.mxu0 %v4608_v56  ;;  %v4697_v55 = vld [vmem:[#allocation7 + $0x4c4] ss:$16 sps:$4 sm:$0xff]   ;;  %v4700_v56 = vld [vmem:[#allocation7 + $0x4cc] ss:$16 sps:$4 sm:$0xff]  }
 0x4cb   :  { %2910 = vmatprep.subr.bf16.mxu1 %v4613_v57  ;;  %3033 = vmatprep.subr.bf16.mxu0 %v4616_v58  ;;  %v4695_v57 = vld [vmem:[#allocation7 + $0x4c0] ss:$16 sps:$4 sm:$0xff]   ;;  %v4698_v58 = vld [vmem:[#allocation7 + $0x4c8] ss:$16 sps:$4 sm:$0xff]  }
 0x4ce   :  { %2911 = vmatpush1.bf16.msra.mxu1 %v4611_v59  ;;  %3034 = vmatpush1.bf16.msra.mxu0 %v4614_v62  ;;  %v4703_v59 = vld [vmem:[#allocation7 + $0x4e4] ss:$16 sps:$4 sm:$0xff]   ;;  %v4706_v62 = vld [vmem:[#allocation7 + $0x4ec] ss:$16 sps:$4 sm:$0xff]  }
 0x4cf   :  { %2912 = vmatprep.subr.bf16.mxu1 %v4619_v63  ;;  %3035 = vmatprep.subr.bf16.mxu0 %v4622_v0  ;;  %v4701_v63 = vld [vmem:[#allocation7 + $0x4e0] ss:$16 sps:$4 sm:$0xff]   ;;  %v4704_v0 = vld [vmem:[#allocation7 + $0x4e8] ss:$16 sps:$4 sm:$0xff]  }
 0x4d2   :  { %2913 = vmatpush1.bf16.msra.mxu1 %v4617_v1  ;;  %3036 = vmatpush1.bf16.msra.mxu0 %v4620_v2  ;;  %v4709_v1 = vld [vmem:[#allocation7 + $0x504] ss:$16 sps:$4 sm:$0xff]   ;;  %v4712_v2 = vld [vmem:[#allocation7 + $0x50c] ss:$16 sps:$4 sm:$0xff]  }
 0x4d3   :  { %2914 = vmatprep.subr.bf16.mxu1 %v4625_v5  ;;  %3037 = vmatprep.subr.bf16.mxu0 %v4628_v53  ;;  %v4707_v5 = vld [vmem:[#allocation7 + $0x500] ss:$16 sps:$4 sm:$0xff]   ;;  %v4710_v53 = vld [vmem:[#allocation7 + $0x508] ss:$16 sps:$4 sm:$0xff]  }
 0x4d6   :  { %2915 = vmatpush1.bf16.msra.mxu1 %v4623_v61  ;;  %3038 = vmatpush1.bf16.msra.mxu0 %v4626_v6  ;;  %v4715_v61 = vld [vmem:[#allocation7 + $0x524] ss:$16 sps:$4 sm:$0xff]   ;;  %v4718_v6 = vld [vmem:[#allocation7 + $0x52c] ss:$16 sps:$4 sm:$0xff]  }
 0x4d7   :  { %2916 = vmatprep.subr.bf16.mxu1 %v4631_v8  ;;  %3039 = vmatprep.subr.bf16.mxu0 %v4634_v9  ;;  %v4713_v8 = vld [vmem:[#allocation7 + $0x520] ss:$16 sps:$4 sm:$0xff]   ;;  %v4716_v9 = vld [vmem:[#allocation7 + $0x528] ss:$16 sps:$4 sm:$0xff]  }
 0x4da   :  { %2917 = vmatpush1.bf16.msra.mxu1 %v4629_v10  ;;  %3040 = vmatpush1.bf16.msra.mxu0 %v4632_v11  ;;  %v4721_v10 = vld [vmem:[#allocation7 + $0x544] ss:$16 sps:$4 sm:$0xff]   ;;  %v4724_v11 = vld [vmem:[#allocation7 + $0x54c] ss:$16 sps:$4 sm:$0xff]  }
 0x4db   :  { %2918 = vmatprep.subr.bf16.mxu1 %v4637_v12  ;;  %3041 = vmatprep.subr.bf16.mxu0 %v4640_v15  ;;  %v4719_v12 = vld [vmem:[#allocation7 + $0x540] ss:$16 sps:$4 sm:$0xff]   ;;  %v4722_v15 = vld [vmem:[#allocation7 + $0x548] ss:$16 sps:$4 sm:$0xff]  }
 0x4de   :  { %2919 = vmatpush1.bf16.msra.mxu1 %v4635_v16  ;;  %3042 = vmatpush1.bf16.msra.mxu0 %v4638_v17  ;;  %v4727_v16 = vld [vmem:[#allocation7 + $0x564] ss:$16 sps:$4 sm:$0xff]   ;;  %v4730_v17 = vld [vmem:[#allocation7 + $0x56c] ss:$16 sps:$4 sm:$0xff]  }
 0x4df   :  { %2920 = vmatprep.subr.bf16.mxu1 %v4643_v18  ;;  %3043 = vmatprep.subr.bf16.mxu0 %v4646_v19  ;;  %v4725_v18 = vld [vmem:[#allocation7 + $0x560] ss:$16 sps:$4 sm:$0xff]   ;;  %v4728_v19 = vld [vmem:[#allocation7 + $0x568] ss:$16 sps:$4 sm:$0xff]  }
 0x4e2   :  { %2921 = vmatpush1.bf16.msra.mxu1 %v4641_v21  ;;  %3044 = vmatpush1.bf16.msra.mxu0 %v4644_v60  ;;  %v4733_v21 = vld [vmem:[#allocation7 + $0x584] ss:$16 sps:$4 sm:$0xff]   ;;  %v4736_v60 = vld [vmem:[#allocation7 + $0x58c] ss:$16 sps:$4 sm:$0xff]  }
 0x4e3   :  { %2922 = vmatprep.subr.bf16.mxu1 %v4649_v24  ;;  %3045 = vmatprep.subr.bf16.mxu0 %v4652_v25  ;;  %v4731_v24 = vld [vmem:[#allocation7 + $0x580] ss:$16 sps:$4 sm:$0xff]   ;;  %v4734_v25 = vld [vmem:[#allocation7 + $0x588] ss:$16 sps:$4 sm:$0xff]  }
 0x4e6   :  { %2923 = vmatpush1.bf16.msra.mxu1 %v4647_v26  ;;  %3046 = vmatpush1.bf16.msra.mxu0 %v4650_v27  ;;  %v4739_v26 = vld [vmem:[#allocation7 + $0x5a4] ss:$16 sps:$4 sm:$0xff]   ;;  %v4742_v27 = vld [vmem:[#allocation7 + $0x5ac] ss:$16 sps:$4 sm:$0xff]  }
 0x4e7   :  { %2924 = vmatprep.subr.bf16.mxu1 %v4655_v29  ;;  %3047 = vmatprep.subr.bf16.mxu0 %v4658_v30  ;;  %v4737_v29 = vld [vmem:[#allocation7 + $0x5a0] ss:$16 sps:$4 sm:$0xff]   ;;  %v4740_v30 = vld [vmem:[#allocation7 + $0x5a8] ss:$16 sps:$4 sm:$0xff]  }
 0x4ea   :  { %2925 = vmatpush1.bf16.msra.mxu1 %v4653_v31  ;;  %3048 = vmatpush1.bf16.msra.mxu0 %v4656_v52  ;;  %v4745_v31 = vld [vmem:[#allocation7 + $0x5c4] ss:$16 sps:$4 sm:$0xff]   ;;  %v4748_v52 = vld [vmem:[#allocation7 + $0x5cc] ss:$16 sps:$4 sm:$0xff]  }
 0x4eb   :  { %2935 = vmatprep.subr.bf16.mxu1 %v4661_v32  ;;  %3058 = vmatprep.subr.bf16.mxu0 %v4664_v33  ;;  %v4743_v32 = vld [vmem:[#allocation7 + $0x5c0] ss:$16 sps:$4 sm:$0xff]   ;;  %v4746_v33 = vld [vmem:[#allocation7 + $0x5c8] ss:$16 sps:$4 sm:$0xff]  }
 0x4ed   :  { %2927 = vmatmul.mubr.bf16.vlgmr.msra.gmra.mrb[4].mxu1 %v1885_v35  ;;  %3050 = vmatmul.mubr.bf16.vlgmr.msra.gmra.mrb[8].mxu0 %v1885_v35  ;;  %v4754_v35 = vld [vmem:[#allocation7 + $0x5ec] ss:$16 sps:$4 sm:$0xff]  }
 0x4ee   :  { %2936 = vmatpush1.bf16.msra.mxu1 %v4659_v34  ;;  %2967 = vmatprep.mubr.bf16.mxu1 %v5381_v22  ;;  %v4751_v34 = vld [vmem:[#allocation7 + $0x5e4] ss:$16 sps:$4 sm:$0xff]  }
 0x4ef   :  { %3059 = vmatpush1.bf16.msra.mxu0 %v4662_v36  ;;  %3090 = vmatprep.mubr.bf16.mxu0 %v5381_v22  ;;  %v4688_v22 = vld [vmem:[#allocation7 + $0x48c] ss:$16 sps:$4 sm:$0xff]   ;;  %v4749_v36 = vld [vmem:[#allocation7 + $0x5e0] ss:$16 sps:$4 sm:$0xff]  }
 0x4f0   :  { %2937 = vmatprep.subr.bf16.mxu1 %v4667_v37  ;;  %3060 = vmatprep.subr.bf16.mxu0 %v4670_v39  ;;  %v4752_v37 = vld [vmem:[#allocation7 + $0x5e8] ss:$16 sps:$4 sm:$0xff]   ;;  %v4757_v39 = vld [vmem:[#allocation8 + $0x4] ss:$8 sps:$4 sm:$0xff]  }
 0x4f2   :  { %2938 = vmatpush1.bf16.msra.mxu1 %v4665_v41  ;;  %v4755_v41 = vld [vmem:[#allocation8] ss:$8 sps:$4 sm:$0xff]  }
 0x4f3   :  { %3061 = vmatpush1.bf16.msra.mxu0 %v4668_v42  ;;  %2939 = vmatprep.subr.bf16.mxu1 %v4673_v43  ;;  %v4760_v42 = vld [vmem:[#allocation8 + $0x14] ss:$8 sps:$4 sm:$0xff]   ;;  %v4758_v43 = vld [vmem:[#allocation8 + $0x10] ss:$8 sps:$4 sm:$0xff]  }
 0x4f4   :  { %3062 = vmatprep.subr.bf16.mxu0 %v4676_v4  ;;  %v4763_v4 = vld [vmem:[#allocation8 + $0x24] ss:$8 sps:$4 sm:$0xff]  }
 0x4f6   :  { %2940 = vmatpush1.bf16.msra.mxu1 %v4671_v28  ;;  %v4761_v28 = vld [vmem:[#allocation8 + $0x20] ss:$8 sps:$4 sm:$0xff]  }
 0x4f7   :  { %3063 = vmatpush1.bf16.msra.mxu0 %v4674_v13  ;;  %2941 = vmatprep.subr.bf16.mxu1 %v4679_v44  ;;  %v4766_v13 = vld [vmem:[#allocation8 + $0x34] ss:$8 sps:$4 sm:$0xff]   ;;  %v4764_v44 = vld [vmem:[#allocation8 + $0x30] ss:$8 sps:$4 sm:$0xff]  }
 0x4f8   :  { %3064 = vmatprep.subr.bf16.mxu0 %v4682_v45  ;;  %v4769_v45 = vld [vmem:[#allocation8 + $0x44] ss:$8 sps:$4 sm:$0xff]  }
 0x4fa   :  { %2942 = vmatpush1.bf16.msra.mxu1 %v4677_v46  ;;  %v4767_v46 = vld [vmem:[#allocation8 + $0x40] ss:$8 sps:$4 sm:$0xff]  }
 0x4fb   :  { %3065 = vmatpush1.bf16.msra.mxu0 %v4680_v23  ;;  %2943 = vmatprep.subr.bf16.mxu1 %v4685_v47  ;;  %v4772_v23 = vld [vmem:[#allocation8 + $0x54] ss:$8 sps:$4 sm:$0xff]   ;;  %v4770_v47 = vld [vmem:[#allocation8 + $0x50] ss:$8 sps:$4 sm:$0xff]  }
 0x4fc   :  { %3066 = vmatprep.subr.bf16.mxu0 %v4688_v22  ;;  %v4773_v22 = vld [vmem:[#allocation8 + $0x60] ss:$8 sps:$4 sm:$0xff]  }
 0x4fe   :  { %2944 = vmatpush1.bf16.msra.mxu1 %v4683_v48  ;;  %v4778_v48 = vld [vmem:[#allocation8 + $0x74] ss:$8 sps:$4 sm:$0xff]  }
 0x4ff   :  { %3067 = vmatpush1.bf16.msra.mxu0 %v4686_v49  ;;  %2945 = vmatprep.subr.bf16.mxu1 %v4691_v50  ;;  %v4776_v49 = vld [vmem:[#allocation8 + $0x70] ss:$8 sps:$4 sm:$0xff]   ;;  %v4781_v50 = vld [vmem:[#allocation8 + $0x84] ss:$8 sps:$4 sm:$0xff]  }
 0x500   :  { %3068 = vmatprep.subr.bf16.mxu0 %v4694_v51  ;;  %v4779_v51 = vld [vmem:[#allocation8 + $0x80] ss:$8 sps:$4 sm:$0xff]  }
 0x502   :  { %2946 = vmatpush1.bf16.msra.mxu1 %v4689_v54  ;;  %v4784_v54 = vld [vmem:[#allocation8 + $0x94] ss:$8 sps:$4 sm:$0xff]  }
 0x503   :  { %3069 = vmatpush1.bf16.msra.mxu0 %v4692_v14  ;;  %2947 = vmatprep.subr.bf16.mxu1 %v4697_v55  ;;  %v4782_v14 = vld [vmem:[#allocation8 + $0x90] ss:$8 sps:$4 sm:$0xff]   ;;  %v4787_v55 = vld [vmem:[#allocation8 + $0xa4] ss:$8 sps:$4 sm:$0xff]  }
 0x504   :  { %3070 = vmatprep.subr.bf16.mxu0 %v4700_v56  ;;  %v4785_v56 = vld [vmem:[#allocation8 + $0xa0] ss:$8 sps:$4 sm:$0xff]  }
 0x506   :  { %2948 = vmatpush1.bf16.msra.mxu1 %v4695_v57  ;;  %v4788_v57 = vld [vmem:[#allocation8 + $0xb0] ss:$8 sps:$4 sm:$0xff]  }
 0x507   :  { %3071 = vmatpush1.bf16.msra.mxu0 %v4698_v58  ;;  %2949 = vmatprep.subr.bf16.mxu1 %v4703_v59  ;;  %v4790_v58 = vld [vmem:[#allocation8 + $0xb4] ss:$8 sps:$4 sm:$0xff]   ;;  %v4793_v59 = vld [vmem:[#allocation8 + $0xc4] ss:$8 sps:$4 sm:$0xff]  }
 0x508   :  { %3072 = vmatprep.subr.bf16.mxu0 %v4706_v62  ;;  %v4791_v62 = vld [vmem:[#allocation8 + $0xc0] ss:$8 sps:$4 sm:$0xff]  }
 0x50a   :  { %2950 = vmatpush1.bf16.msra.mxu1 %v4701_v63  ;;  %v4796_v63 = vld [vmem:[#allocation8 + $0xd4] ss:$8 sps:$4 sm:$0xff]  }
 0x50b   :  { %3073 = vmatpush1.bf16.msra.mxu0 %v4704_v0  ;;  %2951 = vmatprep.subr.bf16.mxu1 %v4709_v1  ;;  %v4794_v0 = vld [vmem:[#allocation8 + $0xd0] ss:$8 sps:$4 sm:$0xff]   ;;  %v4799_v1 = vld [vmem:[#allocation8 + $0xe4] ss:$8 sps:$4 sm:$0xff]  }
 0x50c   :  { %3074 = vmatprep.subr.bf16.mxu0 %v4712_v2  ;;  %v4797_v2 = vld [vmem:[#allocation8 + $0xe0] ss:$8 sps:$4 sm:$0xff]  }
 0x50e   :  { %2952 = vmatpush1.bf16.msra.mxu1 %v4707_v5  ;;  %v4802_v5 = vld [vmem:[#allocation8 + $0xf4] ss:$8 sps:$4 sm:$0xff]  }
 0x50f   :  { %3075 = vmatpush1.bf16.msra.mxu0 %v4710_v53  ;;  %2953 = vmatprep.subr.bf16.mxu1 %v4715_v61  ;;  %v4800_v53 = vld [vmem:[#allocation8 + $0xf0] ss:$8 sps:$4 sm:$0xff]   ;;  %v4805_v61 = vld [vmem:[#allocation8 + $0x104] ss:$8 sps:$4 sm:$0xff]  }
 0x510   :  { %3076 = vmatprep.subr.bf16.mxu0 %v4718_v6  ;;  %v4851_v6 = vld [vmem:[#allocation10 + $0x40] sm:$0xff]  }
 0x512   :  { %2954 = vmatpush1.bf16.msra.mxu1 %v4713_v8  ;;  %v4852_v8 = vld [vmem:[#allocation10] sm:$0xff]  }
 0x513   :  { %3077 = vmatpush1.bf16.msra.mxu0 %v4716_v9  ;;  %2955 = vmatprep.subr.bf16.mxu1 %v4721_v10  ;;  %v4853_v9 = vld [vmem:[#allocation10 + $0x48] sm:$0xff]  }
 0x514   :  { %3078 = vmatprep.subr.bf16.mxu0 %v4724_v11  ;;  %v4854_v10 = vld [vmem:[#allocation10 + $0x8] sm:$0xff]   ;;  %v4855_v11 = vld [vmem:[#allocation10 + $0x50] sm:$0xff]  }
 0x516   :  { %2956 = vmatpush1.bf16.msra.mxu1 %v4719_v12  ;;  %v4856_v12 = vld [vmem:[#allocation10 + $0x10] sm:$0xff]  }
 0x517   :  { %3079 = vmatpush1.bf16.msra.mxu0 %v4722_v15  ;;  %2957 = vmatprep.subr.bf16.mxu1 %v4727_v16  ;;  %v4857_v15 = vld [vmem:[#allocation10 + $0x58] sm:$0xff]  }
 0x518   :  { %3080 = vmatprep.subr.bf16.mxu0 %v4730_v17  ;;  %v4858_v16 = vld [vmem:[#allocation10 + $0x18] sm:$0xff]   ;;  %v4859_v17 = vld [vmem:[#allocation10 + $0x60] sm:$0xff]  }
 0x51a   :  { %2958 = vmatpush1.bf16.msra.mxu1 %v4725_v18  ;;  %v4860_v18 = vld [vmem:[#allocation10 + $0x20] sm:$0xff]  }
 0x51b   :  { %3081 = vmatpush1.bf16.msra.mxu0 %v4728_v19  ;;  %2959 = vmatprep.subr.bf16.mxu1 %v4733_v21  ;;  %v4861_v19 = vld [vmem:[#allocation10 + $0x68] sm:$0xff]   ;;  %v1817_v21 = vld [vmem:[%s5450_s8] sm:$0xf] }
 0x51c   :  { %3082 = vmatprep.subr.bf16.mxu0 %v4736_v60  ;;  %v1829_v60 = vsub.s32 2, %v5213_v3 }
 0x51e   :  { %2960 = vmatpush1.bf16.msra.mxu1 %v4731_v24  ;;  %v1833_v24 = vsub.s32 3, %v5213_v3 }
 0x51f   :  { %3083 = vmatpush1.bf16.msra.mxu0 %v4734_v25  ;;  %2961 = vmatprep.subr.bf16.mxu1 %v4739_v26  ;;  %v4862_v25 = vld [vmem:[#allocation10 + $0x28] sm:$0xff]   ;;  %v1822_v26 = vrot.slane %v1817_v21, %v5329_v38 }
 0x520   :  { %3084 = vmatprep.subr.bf16.mxu0 %v4742_v27  ;;  %v1830_v27 = vrot.slane %v1817_v21, %v1829_v60 }
 0x522   :  { %2962 = vmatpush1.bf16.msra.mxu1 %v4737_v29  ;;  %v1826_v29 = vrot.slane %v1817_v21, %v5335_v40 }
 0x523   :  { %3085 = vmatpush1.bf16.msra.mxu0 %v4740_v30  ;;  %2963 = vmatprep.subr.bf16.mxu1 %v4745_v31  ;;  %v1834_v30 = vrot.slane %v1817_v21, %v1833_v24 }
 0x524   :  { %3086 = vmatprep.subr.bf16.mxu0 %v4748_v52 }
 0x526   :  { %2964 = vmatpush1.bf16.msra.mxu1 %v4743_v32 }
 0x527   :  { %3087 = vmatpush1.bf16.msra.mxu0 %v4746_v33  ;;  %2965 = vmatprep.subr.bf16.mxu1 %v4751_v34 }
 0x528   :  { %3088 = vmatprep.subr.bf16.mxu0 %v4754_v35 }
 0x52a   :  { %2966 = vmatpush1.bf16.msra.mxu1 %v4749_v36 }
 0x52b   :  { %3089 = vmatpush1.bf16.msra.mxu0 %v4752_v37  ;;  %3665 = vmatprep.subr.bf16.mxu1 %v4757_v39 }
 0x52c   :  { %4298 = vmatprep.subr.bf16.mxu0 %v4851_v6 }
 0x52d   :  { %2968 = vmatmul.mubr.bf16.vlgmr.msra.gmra.mrb[4].mxu1 %v5379_v20 }
 0x52e   :  { %3091 = vmatmul.mubr.bf16.vlgmr.msra.gmra.mrb[8].mxu0 %v5379_v20  ;;  %3666 = vmatpush1.bf16.msra.mxu1 %v4755_v41  ;;  %v4775_v20 = vld [vmem:[#allocation8 + $0x64] ss:$8 sps:$4 sm:$0xff]  }
 0x52f   :  { %3667 = vmatprep.subr.bf16.mxu1 %v4760_v42  ;;  %4299 = vmatpush3.bf16.msra.mxu0 %v4852_v8 }
 0x530   :  { %4300 = vmatprep.subr.bf16.mxu0 %v4853_v9 }
 0x532   :  { %3668 = vmatpush1.bf16.msra.mxu1 %v4758_v43 }
 0x533   :  { %3669 = vmatprep.subr.bf16.mxu1 %v4763_v4  ;;  %4301 = vmatpush3.bf16.msra.mxu0 %v4854_v10 }
 0x534   :  { %4302 = vmatprep.subr.bf16.mxu0 %v4855_v11 }
 0x536   :  { %3670 = vmatpush1.bf16.msra.mxu1 %v4761_v28 }
 0x537   :  { %3671 = vmatprep.subr.bf16.mxu1 %v4766_v13  ;;  %4303 = vmatpush3.bf16.msra.mxu0 %v4856_v12 }
 0x538   :  { %4304 = vmatprep.subr.bf16.mxu0 %v4857_v15 }
 0x53a   :  { %3672 = vmatpush1.bf16.msra.mxu1 %v4764_v44 }
 0x53b   :  { %3673 = vmatprep.subr.bf16.mxu1 %v4769_v45  ;;  %4305 = vmatpush3.bf16.msra.mxu0 %v4858_v16 }
 0x53c   :  { %4306 = vmatprep.subr.bf16.mxu0 %v4859_v17 }
 0x53e   :  { %3674 = vmatpush1.bf16.msra.mxu1 %v4767_v46 }
 0x53f   :  { %3675 = vmatprep.subr.bf16.mxu1 %v4772_v23  ;;  %4307 = vmatpush3.bf16.msra.mxu0 %v4860_v18 }
 0x540   :  { %4308 = vmatprep.subr.bf16.mxu0 %v4861_v19 }
 0x542   :  { %3676 = vmatpush1.bf16.msra.mxu1 %v4770_v47 }
 0x543   :  { %3677 = vmatprep.subr.bf16.mxu1 %v4775_v20  ;;  %4309 = vmatpush3.bf16.msra.mxu0 %v4862_v25 }
 0x546   :  { %3678 = vmatpush1.bf16.msra.mxu1 %v4773_v22 }
 0x547   :  { %3679 = vmatprep.subr.bf16.mxu1 %v4778_v48 }
 0x54a   :  { %3680 = vmatpush1.bf16.msra.mxu1 %v4776_v49 }
 0x54b   :  { %3681 = vmatprep.subr.bf16.mxu1 %v4781_v50 }
 0x54e   :  { %3682 = vmatpush1.bf16.msra.mxu1 %v4779_v51 }
 0x54f   :  { %3683 = vmatprep.subr.bf16.mxu1 %v4784_v54 }
 0x552   :  { %3684 = vmatpush1.bf16.msra.mxu1 %v4782_v14 }
 0x553   :  { %3685 = vmatprep.subr.bf16.mxu1 %v4787_v55 }
 0x556   :  { %3686 = vmatpush1.bf16.msra.mxu1 %v4785_v56 }
 0x557   :  { %3687 = vmatprep.subr.bf16.mxu1 %v4790_v58 }
 0x55a   :  { %3688 = vmatpush1.bf16.msra.mxu1 %v4788_v57 }
 0x55b   :  { %3689 = vmatprep.subr.bf16.mxu1 %v4793_v59 }
 0x55e   :  { %3690 = vmatpush1.bf16.msra.mxu1 %v4791_v62 }
 0x55f   :  { %3691 = vmatprep.subr.bf16.mxu1 %v4796_v63 }
 0x562   :  { %3692 = vmatpush1.bf16.msra.mxu1 %v4794_v0 }
 0x563   :  { %3693 = vmatprep.subr.bf16.mxu1 %v4799_v1 }
 0x566   :  { %3694 = vmatpush1.bf16.msra.mxu1 %v4797_v2 }
 0x567   :  { %3695 = vmatprep.subr.bf16.mxu1 %v4802_v5 }
 0x56a   :  { %3696 = vmatpush1.bf16.msra.mxu1 %v4800_v53 }
 0x56b   :  { %3706 = vmatprep.subr.bf16.mxu1 %v4805_v61 }
 0x600   :  { %v2969_v31 = vpop.f32.mrb[4].mxu1 }
 0x601   :  { %v4332_v52 = vadd.f32 %v2969_v31, %v1822_v26  ;;  %v3092_v32 = vpop.f32.mrb[8].mxu0  ;;  %v2971_v33 = vpop.f32.mrb[5].mxu1 }
 0x602   :  { %v4334_v34 = vadd.f32 %v3092_v32, %v1830_v27  ;;  %v4333_v35 = vadd.f32 %v2971_v33, %v1826_v29  ;;  %v3094_v36 = vpop.f32.mrb[9].mxu0  ;;  %v2973_v37 = vpop.f32.mrb[6].mxu1 }
 0x603   :  { %v3099_v39 = vmax.f32 %v4332_v52, 0.0  ;;  %v4335_v3 = vadd.f32 %v3094_v36, %v1834_v30  ;;  %v3096_v41 = vpop.f32.mrb[10].mxu0  ;;  %v2974_v42 = vpop.f32.mrb[7].mxu1 }
 0x604   :  { %v3101_v43 = vmax.f32 %v4334_v34, 0.0  ;;  %v3100_v4 = vmax.f32 %v4333_v35, 0.0  ;;  %v3097_v28 = vpop.f32.mrb[11].mxu0 }
 0x605   :  { %v3102_v13 = vmax.f32 %v4335_v3, 0.0 }
 0x606   :  { %v3107_v44 = vcombine.low %v3099_v39, %v3100_v4 }
 0x607   :  { %v3108_v45 = vcombine.low %v3101_v43, %v3102_v13 }
 0x608   :  { %v3115_v46 = vrot.slane %v3107_v44, %v5222_v7 }
 0x609   :  { %v3122_v23 = vrot.slane %v3108_v45, %v5222_v7 }
 0x60b   :  { %v3123_v47 = vcombine.low %v3115_v46, %v3122_v23  ;;  %v3124_v20 = vcombine.high %v3115_v46, %v3122_v23  ;;  %v4210_v22 = vcombine.low %v3122_v23, %v3122_v23  ;;  %v4211_v48 = vcombine.high %v3122_v23, %v3122_v23 }
 0x60d   :  { %v3132_v49 = vrot.slane %v3123_v47, %v5222_v7  ;;  %v3139_v50 = vrot.slane %v4210_v22, %v5222_v7  ;;  %v3149_v51 = vrot.slane %v3124_v20, %v5222_v7  ;;  %v3156_v54 = vrot.slane %v4211_v48, %v5222_v7 }
 0x60f   :  { %v3140_v14 = vcombine.high %v3132_v49, %v3132_v49  ;;  %v3141_v55 = vcombine.high %v3139_v50, %v3139_v50  ;;  %v3157_v56 = vcombine.high %v3149_v51, %v3149_v51  ;;  %v3158_v57 = vcombine.high %v3156_v54, %v3156_v54 }
 0x610   :  { %v3167_v58 = vsel %vm231_vm2, %v3132_v49, 0.0  ;;  %v3181_v59 = vsel %vm231_vm2, %v3139_v50, 0.0  ;;  %v3195_v62 = vsel %vm231_vm2, %v3149_v51, 0.0  ;;  %v3209_v63 = vsel %vm231_vm2, %v3156_v54, 0.0 }
 0x611   :  { %v3168_v0 = vrot.slane %v3167_v58, 4  ;;  %v3182_v1 = vrot.slane %v3181_v59, 4  ;;  %v3196_v2 = vrot.slane %v3195_v62, 4  ;;  %v3210_v5 = vrot.slane %v3209_v63, 4 }
 0x612   :  { %v3174_v53 = vsel %vm231_vm2, %v3140_v14, 0.0  ;;  %v3202_v7 = vsel %vm231_vm2, %v3157_v56, 0.0  ;;  %v3188_v61 = vsel %vm231_vm2, %v3141_v55, 0.0  ;;  %v3216_v6 = vsel %vm231_vm2, %v3158_v57, 0.0 }
 0x613   :  { %v3175_v8 = vrot.slane %v3174_v53, 4  ;;  %v3203_v9 = vrot.slane %v3202_v7, 4  ;;  %v3169_v10 = vadd.f32 %v3168_v0, %v3167_v58  ;;  %v3197_v11 = vadd.f32 %v3196_v2, %v3195_v62 }
 0x614   :  { %v3189_v12 = vrot.slane %v3188_v61, 4  ;;  %v3217_v15 = vrot.slane %v3216_v6, 4  ;;  %v3183_v16 = vadd.f32 %v3182_v1, %v3181_v59  ;;  %v3211_v17 = vadd.f32 %v3210_v5, %v3209_v63 }
 0x615   :  { %v3176_v18 = vadd.f32 %v3175_v8, %v3174_v53  ;;  %v3204_v19 = vadd.f32 %v3203_v9, %v3202_v7  ;;  %v3170_v21 = vrot.slane %v3169_v10, 2  ;;  %v3198_v60 = vrot.slane %v3197_v11, 2 }
 0x616   :  { %v3190_v24 = vadd.f32 %v3189_v12, %v3188_v61  ;;  %v3218_v25 = vadd.f32 %v3217_v15, %v3216_v6  ;;  %v3184_v26 = vrot.slane %v3183_v16, 2  ;;  %v3212_v27 = vrot.slane %v3211_v17, 2 }
 0x617   :  { %v3177_v29 = vrot.slane %v3176_v18, 2  ;;  %v3205_v30 = vrot.slane %v3204_v19, 2  ;;  %v3171_v31 = vadd.f32 %v3170_v21, %v3169_v10  ;;  %v3199_v52 = vadd.f32 %v3198_v60, %v3197_v11  ;;  %v4803_v21 = vld [vmem:[#allocation8 + $0x100] ss:$8 sps:$4 sm:$0xff]  }
 0x618   :  { %vm3332_vm2 = vcmask 1041409   ;;  %v3191_v32 = vrot.slane %v3190_v24, 2  ;;  %v3219_v33 = vrot.slane %v3218_v25, 2  ;;  %v3185_v34 = vadd.f32 %v3184_v26, %v3183_v16 }
 0x619   :  { %v3213_v35 = vadd.f32 %v3212_v27, %v3211_v17  ;;  %v3178_v36 = vadd.f32 %v3177_v29, %v3176_v18  ;;  %v3206_v37 = vadd.f32 %v3205_v30, %v3204_v19  ;;  %v3172_v39 = vrot.slane %v3171_v31, 1  ;;  %v4806_v27 = vld [vmem:[#allocation8 + $0x110] ss:$8 sps:$4 sm:$0xff]   ;;  %v4811_v29 = vld [vmem:[#allocation8 + $0x124] ss:$8 sps:$4 sm:$0xff]  }
 0x61a   :  { %v3200_v3 = vrot.slane %v3199_v52, 1  ;;  %v3192_v41 = vadd.f32 %v3191_v32, %v3190_v24  ;;  %v3220_v42 = vadd.f32 %v3219_v33, %v3218_v25  ;;  %v3186_v43 = vrot.slane %v3185_v34, 1  ;;  %v4808_v25 = vld [vmem:[#allocation8 + $0x114] ss:$8 sps:$4 sm:$0xff]   ;;  %v4809_v30 = vld [vmem:[#allocation8 + $0x120] ss:$8 sps:$4 sm:$0xff]  }
 0x61b   :  { %v3214_v4 = vrot.slane %v3213_v35, 1  ;;  %v3179_v28 = vrot.slane %v3178_v36, 1  ;;  %v3207_v13 = vrot.slane %v3206_v37, 1  ;;  %v3173_v44 = vadd.f32 %v3172_v39, %v3171_v31  ;;  %v4814_v31 = vld [vmem:[#allocation8 + $0x134] ss:$8 sps:$4 sm:$0xff]  }
 0x61c   :  { %v3201_v45 = vadd.f32 %v3200_v3, %v3199_v52  ;;  %v3193_v46 = vrot.slane %v3192_v41, 1  ;;  %v3221_v23 = vrot.slane %v3220_v42, 1  ;;  %v3187_v47 = vadd.f32 %v3186_v43, %v3185_v34  ;;  %v4812_v52 = vld [vmem:[#allocation8 + $0x130] ss:$8 sps:$4 sm:$0xff]   ;;  %v4817_v32 = vld [vmem:[#allocation8 + $0x144] ss:$8 sps:$4 sm:$0xff]  }
 0x61d   :  { %v3215_v20 = vadd.f32 %v3214_v4, %v3213_v35  ;;  %v3180_v22 = vadd.f32 %v3179_v28, %v3178_v36  ;;  %v3208_v48 = vadd.f32 %v3207_v13, %v3206_v37  ;;  %v3224_v49 = vmul.f32 0.5, %v3173_v44  ;;  %v4815_v33 = vld [vmem:[#allocation8 + $0x140] ss:$8 sps:$4 sm:$0xff]   ;;  %v4820_v34 = vld [vmem:[#allocation8 + $0x154] ss:$8 sps:$4 sm:$0xff]  }
 0x61e   :  { %v3228_v50 = vmul.f32 0.5, %v3201_v45  ;;  %v3194_v51 = vadd.f32 %v3193_v46, %v3192_v41  ;;  %v3222_v54 = vadd.f32 %v3221_v23, %v3220_v42  ;;  %v3226_v14 = vmul.f32 0.5, %v3187_v47  ;;  %v4818_v35 = vld [vmem:[#allocation8 + $0x150] ss:$8 sps:$4 sm:$0xff]   ;;  %v4823_v36 = vld [vmem:[#allocation8 + $0x164] ss:$8 sps:$4 sm:$0xff]  }
 0x61f   :  { %v3230_v55 = vmul.f32 0.5, %v3215_v20  ;;  %v3225_v56 = vmul.f32 0.5, %v3180_v22  ;;  %v3229_v57 = vmul.f32 0.5, %v3208_v48  ;;  %v3232_v58 = vpack.c.bf16 %v3224_v49, %v3224_v49  ;;  %v4821_v37 = vld [vmem:[#allocation8 + $0x160] ss:$8 sps:$4 sm:$0xff]  }
 0x620   :  { %v3236_v59 = vpack.c.bf16 %v3228_v50, %v3228_v50  ;;  %v3227_v62 = vmul.f32 0.5, %v3194_v51  ;;  %v3231_v63 = vmul.f32 0.5, %v3222_v54  ;;  %v3234_v0 = vpack.c.bf16 %v3226_v14, %v3226_v14  ;;  %v4826_v39 = vld [vmem:[#allocation8 + $0x174] ss:$8 sps:$4 sm:$0xff]   ;;  %v4824_v3 = vld [vmem:[#allocation8 + $0x170] ss:$8 sps:$4 sm:$0xff]  }
 0x621   :  { %v3238_v1 = vpack.c.bf16 %v3230_v55, %v3230_v55  ;;  %v3233_v2 = vpack.c.bf16 %v3225_v56, %v3225_v56  ;;  %v3237_v5 = vpack.c.bf16 %v3229_v57, %v3229_v57  ;;  %v3324_v53 = vunpack.c.l.b16 %v3232_v58  ;;  %v4829_v41 = vld [vmem:[#allocation8 + $0x184] ss:$8 sps:$4 sm:$0xff]   ;;  %v4827_v42 = vld [vmem:[#allocation8 + $0x180] ss:$8 sps:$4 sm:$0xff]   ;;  %v4832_v43 = vld [vmem:[#allocation8 + $0x194] ss:$8 sps:$4 sm:$0xff]  }
 0x622   :  { %v3328_v7 = vunpack.c.l.b16 %v3236_v59  ;;  %v3235_v61 = vpack.c.bf16 %v3227_v62, %v3227_v62  ;;  %v3239_v6 = vpack.c.bf16 %v3231_v63, %v3231_v63  ;;  %v3326_v8 = vunpack.c.l.b16 %v3234_v0  ;;  %v4830_v4 = vld [vmem:[#allocation8 + $0x190] ss:$8 sps:$4 sm:$0xff]   ;;  %v4835_v28 = vld [vmem:[#allocation8 + $0x1a4] ss:$8 sps:$4 sm:$0xff]   ;;  %v4833_v13 = vld [vmem:[#allocation8 + $0x1a0] ss:$8 sps:$4 sm:$0xff]  }
 0x623   :  { %v3330_v9 = vunpack.c.l.b16 %v3238_v1  ;;  %v3325_v10 = vunpack.c.l.b16 %v3233_v2  ;;  %v3329_v11 = vunpack.c.l.b16 %v3237_v5  ;;  %v4838_v44 = vld [vmem:[#allocation8 + $0x1b4] ss:$8 sps:$4 sm:$0xff]   ;;  %v4836_v45 = vld [vmem:[#allocation8 + $0x1b0] ss:$8 sps:$4 sm:$0xff]   ;;  %v4841_v46 = vld [vmem:[#allocation8 + $0x1c4] ss:$8 sps:$4 sm:$0xff]  }
 0x624   :  { %v3333_v12 = vsel %vm3332_vm2, %v3328_v7, %v3324_v53  ;;  %v3327_v15 = vunpack.c.l.b16 %v3235_v61  ;;  %v3331_v16 = vunpack.c.l.b16 %v3239_v6  ;;  %v4839_v23 = vld [vmem:[#allocation8 + $0x1c0] ss:$8 sps:$4 sm:$0xff]   ;;  %v4844_v47 = vld [vmem:[#allocation8 + $0x1d4] ss:$8 sps:$4 sm:$0xff]   ;;  %v4842_v20 = vld [vmem:[#allocation8 + $0x1d0] ss:$8 sps:$4 sm:$0xff]  }
 0x625   :  { %v5416_v17 = vsel %vm3332_vm2, %v3330_v9, %v3326_v8  ;;  %v3334_v18 = vsel %vm3332_vm2, %v3329_v11, %v3325_v10  ;;  %v3337_v24 = vpack.c.b16 %v3333_v12, %v3333_v12  ;;  %v4847_v22 = vld [vmem:[#allocation8 + $0x1e4] ss:$8 sps:$4 sm:$0xff]   ;;  %v4845_v48 = vld [vmem:[#allocation8 + $0x1e0] ss:$8 sps:$4 sm:$0xff]   ;;  %v4850_v49 = vld [vmem:[#allocation8 + $0x1f4] ss:$8 sps:$4 sm:$0xff]  }
 0x626   :  { %v3338_v19 = vpack.c.b16 %v3334_v18, %v3334_v18  ;;  %v3336_v60 = vsel %vm3332_vm2, %v3331_v16, %v3327_v15  ;;  %v4848_v50 = vld [vmem:[#allocation8 + $0x1f0] ss:$8 sps:$4 sm:$0xff]   ;;  %v3339_v51 = vpack.c.b16 %v5416_v17, %v5416_v17  ;;  %v3304_v57 = vld [vmem:[%s5452_s10] sm:$0x3]  ;;  %s5023_s10 = smov [#allocation11]  }
 0x627   :  { %v3340_v26 = vpack.c.b16 %v3336_v60, %v3336_v60  ;;  %v4863_v54 = vld [vmem:[#allocation10 + $0x70] sm:$0xff]   ;;  %v4865_v55 = vld [vmem:[#allocation10 + $0x78] sm:$0xff]   ;;  %v3309_v58 = vrot.slane %v3304_v57, %v5329_v38  ;;  %v3313_v59 = vrot.slane %v3304_v57, %v5335_v40  ;;  %v4276_v9 = vld [vmem:[%s5454_s12] ss:$0 sm:$0xff]  ;;  %s3933_s21 = sshll.u32 %s5023_s10, 4  ;;  %s3934_s21 = int_to_ptr.vmem [resolvable:$true] %s3933_s21 }
 0x628   :  { %3697 = vmatprep.mubr.bf16.mxu1 %v3338_v19  ;;  %v4864_v14 = vld [vmem:[#allocation10 + $0x30] sm:$0xff]   ;;  %4310 = vmatprep.subr.bf16.mxu0 %v4863_v54  ;;  %v4866_v56 = vld [vmem:[#allocation10 + $0x38] sm:$0xff]   ;;  %s4977_s22 = scalar_lea.vmem %s3934_s21, 32  ;;  %p4982_p13 = scmp.lt.s32.totalorder %s3934_s21, %s3934_s21 }
 0x629   :  { %3698 = vmatmul.mubr.bf16.vlgmr.msra.gmra.mrb[8].mxu1 %v3337_v24  ;;  %4311 = vmatpush3.bf16.msra.mxu0 %v4864_v14  ;;  %p4978_p12 = scmp.ne.s32.totalorder %s3934_s21, %s4977_s22  ;;  %p4983_p0 = scmp.lt.s32.totalorder %s4977_s22, %s4977_s22 }
 0x62a   :  { %3707 = vmatpush1.bf16.msra.mxu1 %v4803_v21  ;;  %3738 = vmatprep.mubr.bf16.mxu1 %v3340_v26 }
 0x62b   :  { %3708 = vmatprep.subr.bf16.mxu1 %v4808_v25  ;;  %4312 = vmatprep.subr.bf16.mxu0 %v4865_v55  ;;  %p4984_p1 = por %p4983_p0, %p4982_p13 }
 0x62d   :  { %4313 = vmatpush3.bf16.msra.mxu0 %v4866_v56  ;;  %p4985_p2 = pnand %p4984_p1, %p4978_p12 }
 0x62e   :  { %3709 = vmatpush1.bf16.msra.mxu1 %v4806_v27 }
 0x62f   :  { %3710 = vmatprep.subr.bf16.mxu1 %v4811_v29 }
 0x632   :  { %3711 = vmatpush1.bf16.msra.mxu1 %v4809_v30 }
 0x633   :  { %3712 = vmatprep.subr.bf16.mxu1 %v4814_v31 }
 0x636   :  { %3713 = vmatpush1.bf16.msra.mxu1 %v4812_v52 }
 0x637   :  { %3714 = vmatprep.subr.bf16.mxu1 %v4817_v32 }
 0x63a   :  { %3715 = vmatpush1.bf16.msra.mxu1 %v4815_v33 }
 0x63b   :  { %3716 = vmatprep.subr.bf16.mxu1 %v4820_v34 }
 0x63e   :  { %3717 = vmatpush1.bf16.msra.mxu1 %v4818_v35 }
 0x63f   :  { %3718 = vmatprep.subr.bf16.mxu1 %v4823_v36 }
 0x642   :  { %3719 = vmatpush1.bf16.msra.mxu1 %v4821_v37 }
 0x643   :  { %3720 = vmatprep.subr.bf16.mxu1 %v4826_v39 }
 0x646   :  { %3721 = vmatpush1.bf16.msra.mxu1 %v4824_v3 }
 0x647   :  { %3722 = vmatprep.subr.bf16.mxu1 %v4829_v41 }
 0x64a   :  { %3723 = vmatpush1.bf16.msra.mxu1 %v4827_v42 }
 0x64b   :  { %3724 = vmatprep.subr.bf16.mxu1 %v4832_v43 }
 0x64e   :  { %3725 = vmatpush1.bf16.msra.mxu1 %v4830_v4 }
 0x64f   :  { %3726 = vmatprep.subr.bf16.mxu1 %v4835_v28 }
 0x652   :  { %3727 = vmatpush1.bf16.msra.mxu1 %v4833_v13 }
 0x653   :  { %3728 = vmatprep.subr.bf16.mxu1 %v4838_v44 }
 0x656   :  { %3729 = vmatpush1.bf16.msra.mxu1 %v4836_v45 }
 0x657   :  { %3730 = vmatprep.subr.bf16.mxu1 %v4841_v46 }
 0x65a   :  { %3731 = vmatpush1.bf16.msra.mxu1 %v4839_v23 }
 0x65b   :  { %3732 = vmatprep.subr.bf16.mxu1 %v4844_v47 }
 0x65e   :  { %3733 = vmatpush1.bf16.msra.mxu1 %v4842_v20 }
 0x65f   :  { %3734 = vmatprep.subr.bf16.mxu1 %v4847_v22 }
 0x662   :  { %3735 = vmatpush1.bf16.msra.mxu1 %v4845_v48 }
 0x663   :  { %3736 = vmatprep.subr.bf16.mxu1 %v4850_v49 }
 0x666   :  { %3737 = vmatpush1.bf16.msra.mxu1 %v4848_v50 }
 0x669   :  { %3739 = vmatmul.mubr.bf16.vlgmr.msra.gmra.mrb[8].mxu1 %v3339_v51 }
 0x73c   :  { %v3740_v62 = vpop.f32.mrb[8].mxu1 }
 0x73d   :  { %v4336_v63 = vadd.f32 %v3740_v62, %v3309_v58  ;;  %v3742_v0 = vpop.f32.mrb[9].mxu1 }
 0x73e   :  { %v4337_v1 = vadd.f32 %v3742_v0, %v3313_v59  ;;  %v3744_v2 = vpop.f32.mrb[10].mxu1 }
 0x73f   :  { %v3747_v5 = vmax.f32 %v4336_v63, 0.0  ;;  %v3745_v53 = vpop.f32.mrb[11].mxu1 }
 0x740   :  { %v3748_v7 = vmax.f32 %v4337_v1, 0.0 }
 0x741   :  { %v3749_v6 = vpack.c.bf16 %v3747_v5, %v3747_v5 }
 0x742   :  { %v3750_v61 = vpack.c.bf16 %v3748_v7, %v3748_v7 }
 0x744   :  { %3918 = vmatprep.mubr.bf16.mxu0 %v3750_v61 }
 0x745   :  { %3919 = vmatmul.mubr.bf16.vlgmr.msra.gmra.mrb[12].mxu0 %v3749_v6 }
 0x818   :  { %v4314_v8 = vpop.f32.mrb[12].mxu0 }
 0x819   :  { %v4315_v38 = vpop.f32.mrb[13].mxu0 }
 0x81a   :  { %v4316_v40 = vadd.f32 %v4315_v38, %v4314_v8  ;;  %v4317_v10 = vpop.f32.mrb[14].mxu0 }
 0x81b   :  { %v4318_v11 = vpop.f32.mrb[15].mxu0 }
 0x81c   :  { %v3921_v12 = vadd.f32 %v4316_v40, %v4276_v9 }
 0x81e   :  { %3926 = vst [vmem:[#allocation11] sm:$0x3] %v3921_v12 }
 0x81f   :  { %4988 = shalt.err (!%p4985_p2)
}
 0x820   :  { %s4989_s12 = scalar_lea.hbm %s5455_s13, 32 }
 0x821   :  { %p4990_p3 = scmp.ne.s32.totalorder %s5455_s13, %s4989_s12  ;;  %p4993_p4 = scmp.lt.u32.totalorder %s4989_s12, %s5455_s13 }
 0x823   :  { %p4995_p5 = pnand %p4993_p4, %p4990_p3 }
 0x825   :  { %4998 = shalt.err (!%p4995_p5)
}
 0x826   :  { %3936 = dma.vmem_to_hbm [thread:$0]  %s3934_s21, 32, %s5455_s13, [#allocation4]  }
 0x827   :  { %5005 = dma.done.wait [#allocation4], 32  }
 0x828   :  { %5006 = vsyncadd [#allocation4], 4294967264 }
 0x829   :  { %3940 = vsyncpa [#allocation3], 1 }
 0x82a   :  { %3941 = vsyncpa [#allocation6], 1 }
 0x82b   :  { %3942 = vsyncpa [#allocation9], 1 }
 0x82c   :  { %3943 = vsyncpa [#allocation4], 1 }

</bundles_post_ra>
